<compile_context>
chip_gen: v6e
topology: v6e:2x2x1
jax: 0.10.0
libtpu: 0.0.40
codegen_flags: <defaults>
</compile_context>

<pallas_src>
import functools
import math

import jax
import jax.numpy as jnp
from jax import lax
from jax.experimental import pallas as pl
from jax.experimental.pallas import tpu as pltpu

# ---------------- small BertConfig (synthetic) ----------------
VOCAB_SIZE = 100
MAX_POS = 16
TYPE_VOCAB = 2
HIDDEN = 32
NUM_LAYERS = 2
NUM_HEADS = 2
HEAD_DIM = HIDDEN // NUM_HEADS
INTERMEDIATE = 64
NUM_CLASSES = 3
LN_EPS = 1e-12

VMEM_SPEC = pl.BlockSpec(memory_space=pltpu.MemorySpace.VMEM)


# ---------------- in-kernel helpers ----------------
def _layernorm(x, g, b):
    # Single pass: mean and mean-of-squares in one sweep.
    mu = jnp.mean(x, axis=-1, keepdims=True)
    ms = jnp.mean(x * x, axis=-1, keepdims=True)
    var = ms - mu * mu
    return (x - mu) * lax.rsqrt(var + LN_EPS) * g + b


def _gelu(x):
    # TODO(synk): tanh-approx GELU; PyTorch nn.GELU default is erf-based (~1e-3 diff).
    c = jnp.float32(0.7978845608028654)  # sqrt(2/pi)
    return 0.5 * x * (1.0 + jnp.tanh(c * (x + 0.044715 * x * x * x)))


# ---------------- the fused BERT kernel ----------------
def _bert_fused_kernel(x_ref, mask_ref,
                       emb_g_ref, emb_b_ref,
                       wqkv_ref, bqkv_ref, wo_ref, bo_ref,
                       ln1_g_ref, ln1_b_ref,
                       wi_ref, bi_ref, wf_ref, bf_ref,
                       ln2_g_ref, ln2_b_ref,
                       pool_w_ref, pool_b_ref, fc_w_ref, fc_b_ref,
                       logits_ref, *, batch, seq):
    B, S = batch, seq
    H = HIDDEN
    f32 = jnp.float32
    bf16 = jnp.bfloat16

    # embedding LayerNorm (embedding dropout is identity at inference)
    x = _layernorm(x_ref[...], emb_g_ref[...], emb_b_ref[...])        # [B*S, H]

    # Block-diagonal additive mask [B*S, B*S], materialized once in the wrapper.
    neg = mask_ref[...]

    for l in range(NUM_LAYERS):                 # static unroll (NUM_LAYERS = 2)
        # ---- fused QKV projection (1/sqrt(Dh) folded into Wq at init) ----
        qkv = (jnp.dot(x.astype(bf16), wqkv_ref[l],
                       preferred_element_type=f32) + bqkv_ref[l])      # [B*S, 3H]

        # ---- multi-head attention with flattened batch (B*S <= 128) ----
        ctx = []
        for h in range(NUM_HEADS):              # static unroll (NUM_HEADS = 2)
            q = qkv[:, h * HEAD_DIM:(h + 1) * HEAD_DIM]                # [B*S, Dh]
            k = qkv[:, H + h * HEAD_DIM:H + (h + 1) * HEAD_DIM]
            v = qkv[:, 2 * H + h * HEAD_DIM:2 * H + (h + 1) * HEAD_DIM]

            s = jnp.dot(q, k.T, preferred_element_type=f32) + neg      # [B*S, B*S]
            m = jnp.max(s, axis=-1, keepdims=True)
            p = jnp.exp(s - m)
            p = p * pl.reciprocal(jnp.sum(p, axis=-1, keepdims=True), approx=True)
            ctx.append(jnp.dot(p, v, preferred_element_type=f32))      # [B*S, Dh]

        # ---- output projection: one matmul on concatenated heads ----
        context = jnp.concatenate(ctx, axis=-1)                        # [B*S, H]
        attn = (jnp.dot(context.astype(bf16), wo_ref[l],
                        preferred_element_type=f32) + bo_ref[l])

        # fused residual + LayerNorm
        x = _layernorm(x + attn, ln1_g_ref[l], ln1_b_ref[l])

        # ---- feed-forward ----
        inter = _gelu(jnp.dot(x.astype(bf16), wi_ref[l],
                              preferred_element_type=f32) + bi_ref[l])
        ffn = (jnp.dot(inter.astype(bf16), wf_ref[l],
                       preferred_element_type=f32) + bf_ref[l])

        # fused residual + LayerNorm
        x = _layernorm(x + ffn, ln2_g_ref[l], ln2_b_ref[l])

    # ---- pooler ([CLS] token) + classifier, still in-register ----
    cls = x.reshape(B, S, H)[:, 0, :]                                  # [B, H]
    pooled = jnp.tanh(jnp.dot(cls, pool_w_ref[...],
                              preferred_element_type=f32) + pool_b_ref[...])
    # classifier dropout(0.1) is identity at inference
    logits_ref[...] = (jnp.dot(pooled, fc_w_ref[...],
                               preferred_element_type=f32) + fc_b_ref[...])


# ---------------- deterministic parameter init (packed layout) ----------------
def init_params(key):
    def nrm(k, shape):
        return 0.02 * jax.random.normal(k, shape, jnp.float32)

    keys = iter(jax.random.split(key, 256))
    ones_h = jnp.ones((1, HIDDEN), jnp.float32)
    zeros_h = jnp.zeros((1, HIDDEN), jnp.float32)
    scale = jnp.float32(1.0 / math.sqrt(HEAD_DIM))

    p = {
        "word_emb": nrm(next(keys), (VOCAB_SIZE, HIDDEN)),
        "pos_emb": nrm(next(keys), (MAX_POS, HIDDEN)),
        "type_emb": nrm(next(keys), (TYPE_VOCAB, HIDDEN)),
        "emb_ln_g": ones_h, "emb_ln_b": zeros_h,
    }

    # weights stored [in, out] and applied as x @ W (matches the forward above)
    wqkv, bqkv, wo, bo = [], [], [], []
    ln1_g, ln1_b, wi, bi, wf, bff, ln2_g, ln2_b = [], [], [], [], [], [], [], []
    for _ in range(NUM_LAYERS):
        wq = nrm(next(keys), (HIDDEN, HIDDEN)) * scale   # fold 1/sqrt(Dh) into Wq
        wk = nrm(next(keys), (HIDDEN, HIDDEN))
        wv = nrm(next(keys), (HIDDEN, HIDDEN))
        wqkv.append(jnp.concatenate([wq, wk, wv], axis=1))             # [H, 3H]
        bqkv.append(jnp.zeros((1, 3 * HIDDEN), jnp.float32))           # (bq pre-scaled; zero here)
        wo.append(nrm(next(keys), (HIDDEN, HIDDEN)))
        bo.append(zeros_h)
        ln1_g.append(ones_h); ln1_b.append(zeros_h)
        wi.append(nrm(next(keys), (HIDDEN, INTERMEDIATE)))
        bi.append(jnp.zeros((1, INTERMEDIATE), jnp.float32))
        wf.append(nrm(next(keys), (INTERMEDIATE, HIDDEN)))
        bff.append(zeros_h)
        ln2_g.append(ones_h); ln2_b.append(zeros_h)

    # Matmul weights in bf16 (MXU-native everywhere, halves weight DMA bytes);
    # biases / LN params stay f32.
    p["wqkv"] = jnp.stack(wqkv).astype(jnp.bfloat16)
    p["bqkv"] = jnp.stack(bqkv)
    p["wo"] = jnp.stack(wo).astype(jnp.bfloat16)
    p["bo"] = jnp.stack(bo)
    p["ln1_g"] = jnp.stack(ln1_g); p["ln1_b"] = jnp.stack(ln1_b)
    p["wi"] = jnp.stack(wi).astype(jnp.bfloat16)
    p["bi"] = jnp.stack(bi)
    p["wf"] = jnp.stack(wf).astype(jnp.bfloat16)
    p["bf"] = jnp.stack(bff)
    p["ln2_g"] = jnp.stack(ln2_g); p["ln2_b"] = jnp.stack(ln2_b)

    p["pool_w"] = nrm(next(keys), (HIDDEN, HIDDEN))
    p["pool_b"] = zeros_h
    p["fc_w"] = nrm(next(keys), (HIDDEN, NUM_CLASSES))
    p["fc_b"] = jnp.zeros((1, NUM_CLASSES), jnp.float32)
    return p


# ---------------- forward pass ----------------
def bert_classifier_forward(params, input_ids, attention_mask):
    B, S = input_ids.shape
    assert B * S <= 128, "flattened-batch attention assumes B*S fits one lane tile"

    # embedding-table gathers stay in JAX glue (data-dependent gather)
    we = jnp.take(params["word_emb"], input_ids, axis=0)                  # [B,S,H]
    pe = params["pos_emb"][:S][None, :, :]                                # [1,S,H]
    # TODO(synk): token_type_ids hardcoded to zeros (matches reference default call).
    te = jnp.take(params["type_emb"], jnp.zeros_like(input_ids), axis=0)  # [B,S,H]
    x_emb = (we + pe + te).astype(jnp.float32).reshape(B * S, HIDDEN)

    # Block-diagonal additive mask [B*S, B*S], built ONCE (hoisted out of the
    # kernel's layer/head loops): cross-batch or padded keys get -10000.
    batch_of = jnp.arange(B * S, dtype=jnp.int32) // S
    same_batch = (batch_of[:, None] == batch_of[None, :]).astype(jnp.float32)
    key_ok = attention_mask.astype(jnp.float32).reshape(B * S)
    mask2d = (1.0 - same_batch * key_ok[None, :]) * jnp.float32(-10000.0)

    args = (x_emb, mask2d,
            params["emb_ln_g"], params["emb_ln_b"],
            params["wqkv"], params["bqkv"], params["wo"], params["bo"],
            params["ln1_g"], params["ln1_b"],
            params["wi"], params["bi"], params["wf"], params["bf"],
            params["ln2_g"], params["ln2_b"],
            params["pool_w"], params["pool_b"], params["fc_w"], params["fc_b"])

    # Single gridless pallas_call: every weight (~50 KB) and activation (2 KB)
    # lives in VMEM for the whole forward.  (Scale-up: add a row-tiled grid
    # with dimension_semantics=("parallel",) for megacore / v7x.)
    return pl.pallas_call(
        functools.partial(_bert_fused_kernel, batch=B, seq=S),
        out_shape=jax.ShapeDtypeStruct((B, NUM_CLASSES), jnp.float32),
        in_specs=[VMEM_SPEC] * len(args),
        out_specs=VMEM_SPEC,
    )(*args)


if __name__ == "__main__":
    B, S = 2, 8
    key = jax.random.PRNGKey(0)
    k_ids, k_params = jax.random.split(key)

    input_ids = jax.random.randint(k_ids, (B, S), 0, VOCAB_SIZE, dtype=jnp.int32)
    attention_mask = jnp.ones((B, S), jnp.int32).at[1, 6:].set(0)  # padding on batch 1

    params = init_params(k_params)

    logits = jax.jit(bert_classifier_forward)(params, input_ids, attention_mask)
    logits = jax.block_until_ready(logits)

    assert logits.shape == (B, NUM_CLASSES)
    assert bool(jnp.all(jnp.isfinite(logits)))
    print("KERNEL_OK")
</pallas_src>

<mosaic_0001>
module attributes {stable_mosaic.version = 11 : i64} {
  func.func @_bert_fused_kernel(%arg0: memref<16x32xf32, #tpu.memory_space<vmem>>, %arg1: memref<16x16xf32, #tpu.memory_space<vmem>>, %arg2: memref<1x32xf32, #tpu.memory_space<vmem>>, %arg3: memref<1x32xf32, #tpu.memory_space<vmem>>, %arg4: memref<2x32x96xbf16, #tpu.memory_space<vmem>>, %arg5: memref<2x1x96xf32, #tpu.memory_space<vmem>>, %arg6: memref<2x32x32xbf16, #tpu.memory_space<vmem>>, %arg7: memref<2x1x32xf32, #tpu.memory_space<vmem>>, %arg8: memref<2x1x32xf32, #tpu.memory_space<vmem>>, %arg9: memref<2x1x32xf32, #tpu.memory_space<vmem>>, %arg10: memref<2x32x64xbf16, #tpu.memory_space<vmem>>, %arg11: memref<2x1x64xf32, #tpu.memory_space<vmem>>, %arg12: memref<2x64x32xbf16, #tpu.memory_space<vmem>>, %arg13: memref<2x1x32xf32, #tpu.memory_space<vmem>>, %arg14: memref<2x1x32xf32, #tpu.memory_space<vmem>>, %arg15: memref<2x1x32xf32, #tpu.memory_space<vmem>>, %arg16: memref<32x32xf32, #tpu.memory_space<vmem>>, %arg17: memref<1x32xf32, #tpu.memory_space<vmem>>, %arg18: memref<32x3xf32, #tpu.memory_space<vmem>>, %arg19: memref<1x3xf32, #tpu.memory_space<vmem>>, %arg20: memref<2x3xf32, #tpu.memory_space<vmem>>) attributes {dimension_semantics = [], scalar_prefetch = 0 : i64, scratch_operands = 0 : i64, tpu.core_type = #tpu.core_type<tc>} {
    %c0 = arith.constant 0 : index
    %c0_0 = arith.constant 0 : index
    %0 = vector.load %arg0[%c0, %c0_0] : memref<16x32xf32, #tpu.memory_space<vmem>>, vector<16x32xf32>
    %c0_1 = arith.constant 0 : index
    %c0_2 = arith.constant 0 : index
    %1 = vector.load %arg2[%c0_1, %c0_2] : memref<1x32xf32, #tpu.memory_space<vmem>>, vector<1x32xf32>
    %c0_3 = arith.constant 0 : index
    %c0_4 = arith.constant 0 : index
    %2 = vector.load %arg3[%c0_3, %c0_4] : memref<1x32xf32, #tpu.memory_space<vmem>>, vector<1x32xf32>
    %cst = arith.constant dense<0.000000e+00> : vector<16xf32>
    %3 = vector.multi_reduction <add>, %0, %cst [1] : vector<16x32xf32> to vector<16xf32>
    %4 = vector.shape_cast %3 : vector<16xf32> to vector<16x1xf32>
    %cst_5 = arith.constant 3.200000e+01 : f32
    %5 = vector.broadcast %cst_5 : f32 to vector<16x1xf32>
    %6 = arith.divf %4, %5 : vector<16x1xf32>
    %7 = arith.mulf %0, %0 : vector<16x32xf32>
    %cst_6 = arith.constant dense<0.000000e+00> : vector<16xf32>
    %8 = vector.multi_reduction <add>, %7, %cst_6 [1] : vector<16x32xf32> to vector<16xf32>
    %9 = vector.shape_cast %8 : vector<16xf32> to vector<16x1xf32>
    %cst_7 = arith.constant 3.200000e+01 : f32
    %10 = vector.broadcast %cst_7 : f32 to vector<16x1xf32>
    %11 = arith.divf %9, %10 : vector<16x1xf32>
    %12 = arith.mulf %6, %6 : vector<16x1xf32>
    %13 = arith.subf %11, %12 : vector<16x1xf32>
    %14 = vector.broadcast %6 : vector<16x1xf32> to vector<16x32xf32>
    %15 = arith.subf %0, %14 : vector<16x32xf32>
    %cst_8 = arith.constant 9.99999996E-13 : f32
    %16 = vector.broadcast %cst_8 : f32 to vector<16x1xf32>
    %17 = arith.addf %13, %16 : vector<16x1xf32>
    %18 = math.rsqrt %17 : vector<16x1xf32>
    %19 = vector.broadcast %18 : vector<16x1xf32> to vector<16x32xf32>
    %20 = arith.mulf %15, %19 : vector<16x32xf32>
    %21 = vector.broadcast %1 : vector<1x32xf32> to vector<16x32xf32>
    %22 = arith.mulf %20, %21 : vector<16x32xf32>
    %23 = vector.broadcast %2 : vector<1x32xf32> to vector<16x32xf32>
    %24 = arith.addf %22, %23 : vector<16x32xf32>
    %c0_9 = arith.constant 0 : index
    %c0_10 = arith.constant 0 : index
    %25 = vector.load %arg1[%c0_9, %c0_10] : memref<16x16xf32, #tpu.memory_space<vmem>>, vector<16x16xf32>
    %26 = arith.truncf %24 : vector<16x32xf32> to vector<16x32xbf16>
    %c0_11 = arith.constant 0 : index
    %c0_12 = arith.constant 0 : index
    %c0_13 = arith.constant 0 : index
    %27 = vector.load %arg4[%c0_11, %c0_12, %c0_13] : memref<2x32x96xbf16, #tpu.memory_space<vmem>>, vector<1x32x96xbf16>
    %28 = vector.shape_cast %27 : vector<1x32x96xbf16> to vector<32x96xbf16>
    %cst_14 = arith.constant dense<0.000000e+00> : vector<16x96xf32>
    %29 = tpu.matmul %26, %28, %cst_14 {dimension_numbers = #tpu.dot_dimension_numbers<[1], [0], [0], [1], [0, 0, 1, 1], [], []>} : vector<16x32xbf16>, vector<32x96xbf16>, vector<16x96xf32> -> vector<16x96xf32>
    %c0_15 = arith.constant 0 : index
    %c0_16 = arith.constant 0 : index
    %c0_17 = arith.constant 0 : index
    %30 = vector.load %arg5[%c0_15, %c0_16, %c0_17] : memref<2x1x96xf32, #tpu.memory_space<vmem>>, vector<1x1x96xf32>
    %31 = vector.shape_cast %30 : vector<1x1x96xf32> to vector<1x96xf32>
    %32 = vector.broadcast %31 : vector<1x96xf32> to vector<16x96xf32>
    %33 = arith.addf %29, %32 : vector<16x96xf32>
    %34 = vector.extract_strided_slice %33 {offsets = [0, 0], sizes = [16, 16], strides = [1, 1]} : vector<16x96xf32> to vector<16x16xf32>
    %35 = vector.extract_strided_slice %33 {offsets = [0, 32], sizes = [16, 16], strides = [1, 1]} : vector<16x96xf32> to vector<16x16xf32>
    %36 = vector.extract_strided_slice %33 {offsets = [0, 64], sizes = [16, 16], strides = [1, 1]} : vector<16x96xf32> to vector<16x16xf32>
    %37 = tpu.transpose %35, [1, 0] : vector<16x16xf32> -> vector<16x16xf32>
    %cst_18 = arith.constant dense<0.000000e+00> : vector<16x16xf32>
    %38 = tpu.matmul %34, %37, %cst_18 {dimension_numbers = #tpu.dot_dimension_numbers<[1], [0], [0], [1], [0, 0, 1, 1], [], []>} : vector<16x16xf32>, vector<16x16xf32>, vector<16x16xf32> -> vector<16x16xf32>
    %39 = arith.addf %38, %25 : vector<16x16xf32>
    %cst_19 = arith.constant dense<0xFF800000> : vector<16xf32>
    %40 = vector.multi_reduction <maximumf>, %39, %cst_19 [1] : vector<16x16xf32> to vector<16xf32>
    %41 = vector.shape_cast %40 : vector<16xf32> to vector<16x1xf32>
    %42 = vector.broadcast %41 : vector<16x1xf32> to vector<16x16xf32>
    %43 = arith.subf %39, %42 : vector<16x16xf32>
    %44 = math.exp %43 : vector<16x16xf32>
    %cst_20 = arith.constant dense<0.000000e+00> : vector<16xf32>
    %45 = vector.multi_reduction <add>, %44, %cst_20 [1] : vector<16x16xf32> to vector<16xf32>
    %46 = vector.shape_cast %45 : vector<16xf32> to vector<16x1xf32>
    %47 = tpu.reciprocal %46 {approx = true} : vector<16x1xf32> -> vector<16x1xf32>
    %48 = vector.broadcast %47 : vector<16x1xf32> to vector<16x16xf32>
    %49 = arith.mulf %44, %48 : vector<16x16xf32>
    %cst_21 = arith.constant dense<0.000000e+00> : vector<16x16xf32>
    %50 = tpu.matmul %49, %36, %cst_21 {dimension_numbers = #tpu.dot_dimension_numbers<[1], [0], [0], [1], [0, 0, 1, 1], [], []>} : vector<16x16xf32>, vector<16x16xf32>, vector<16x16xf32> -> vector<16x16xf32>
    %51 = vector.extract_strided_slice %33 {offsets = [0, 16], sizes = [16, 16], strides = [1, 1]} : vector<16x96xf32> to vector<16x16xf32>
    %52 = vector.extract_strided_slice %33 {offsets = [0, 48], sizes = [16, 16], strides = [1, 1]} : vector<16x96xf32> to vector<16x16xf32>
    %53 = vector.extract_strided_slice %33 {offsets = [0, 80], sizes = [16, 16], strides = [1, 1]} : vector<16x96xf32> to vector<16x16xf32>
    %54 = tpu.transpose %52, [1, 0] : vector<16x16xf32> -> vector<16x16xf32>
    %cst_22 = arith.constant dense<0.000000e+00> : vector<16x16xf32>
    %55 = tpu.matmul %51, %54, %cst_22 {dimension_numbers = #tpu.dot_dimension_numbers<[1], [0], [0], [1], [0, 0, 1, 1], [], []>} : vector<16x16xf32>, vector<16x16xf32>, vector<16x16xf32> -> vector<16x16xf32>
    %56 = arith.addf %55, %25 : vector<16x16xf32>
    %cst_23 = arith.constant dense<0xFF800000> : vector<16xf32>
    %57 = vector.multi_reduction <maximumf>, %56, %cst_23 [1] : vector<16x16xf32> to vector<16xf32>
    %58 = vector.shape_cast %57 : vector<16xf32> to vector<16x1xf32>
    %59 = vector.broadcast %58 : vector<16x1xf32> to vector<16x16xf32>
    %60 = arith.subf %56, %59 : vector<16x16xf32>
    %61 = math.exp %60 : vector<16x16xf32>
    %cst_24 = arith.constant dense<0.000000e+00> : vector<16xf32>
    %62 = vector.multi_reduction <add>, %61, %cst_24 [1] : vector<16x16xf32> to vector<16xf32>
    %63 = vector.shape_cast %62 : vector<16xf32> to vector<16x1xf32>
    %64 = tpu.reciprocal %63 {approx = true} : vector<16x1xf32> -> vector<16x1xf32>
    %65 = vector.broadcast %64 : vector<16x1xf32> to vector<16x16xf32>
    %66 = arith.mulf %61, %65 : vector<16x16xf32>
    %cst_25 = arith.constant dense<0.000000e+00> : vector<16x16xf32>
    %67 = tpu.matmul %66, %53, %cst_25 {dimension_numbers = #tpu.dot_dimension_numbers<[1], [0], [0], [1], [0, 0, 1, 1], [], []>} : vector<16x16xf32>, vector<16x16xf32>, vector<16x16xf32> -> vector<16x16xf32>
    %68 = tpu.concatenate %50, %67 in 1 : vector<16x16xf32>, vector<16x16xf32> -> vector<16x32xf32>
    %69 = arith.truncf %68 : vector<16x32xf32> to vector<16x32xbf16>
    %c0_26 = arith.constant 0 : index
    %c0_27 = arith.constant 0 : index
    %c0_28 = arith.constant 0 : index
    %70 = vector.load %arg6[%c0_26, %c0_27, %c0_28] : memref<2x32x32xbf16, #tpu.memory_space<vmem>>, vector<1x32x32xbf16>
    %71 = vector.shape_cast %70 : vector<1x32x32xbf16> to vector<32x32xbf16>
    %cst_29 = arith.constant dense<0.000000e+00> : vector<16x32xf32>
    %72 = tpu.matmul %69, %71, %cst_29 {dimension_numbers = #tpu.dot_dimension_numbers<[1], [0], [0], [1], [0, 0, 1, 1], [], []>} : vector<16x32xbf16>, vector<32x32xbf16>, vector<16x32xf32> -> vector<16x32xf32>
    %c0_30 = arith.constant 0 : index
    %c0_31 = arith.constant 0 : index
    %c0_32 = arith.constant 0 : index
    %73 = vector.load %arg7[%c0_30, %c0_31, %c0_32] : memref<2x1x32xf32, #tpu.memory_space<vmem>>, vector<1x1x32xf32>
    %74 = vector.shape_cast %73 : vector<1x1x32xf32> to vector<1x32xf32>
    %75 = vector.broadcast %74 : vector<1x32xf32> to vector<16x32xf32>
    %76 = arith.addf %72, %75 : vector<16x32xf32>
    %77 = arith.addf %24, %76 : vector<16x32xf32>
    %c0_33 = arith.constant 0 : index
    %c0_34 = arith.constant 0 : index
    %c0_35 = arith.constant 0 : index
    %78 = vector.load %arg8[%c0_33, %c0_34, %c0_35] : memref<2x1x32xf32, #tpu.memory_space<vmem>>, vector<1x1x32xf32>
    %79 = vector.shape_cast %78 : vector<1x1x32xf32> to vector<1x32xf32>
    %c0_36 = arith.constant 0 : index
    %c0_37 = arith.constant 0 : index
    %c0_38 = arith.constant 0 : index
    %80 = vector.load %arg9[%c0_36, %c0_37, %c0_38] : memref<2x1x32xf32, #tpu.memory_space<vmem>>, vector<1x1x32xf32>
    %81 = vector.shape_cast %80 : vector<1x1x32xf32> to vector<1x32xf32>
    %cst_39 = arith.constant dense<0.000000e+00> : vector<16xf32>
    %82 = vector.multi_reduction <add>, %77, %cst_39 [1] : vector<16x32xf32> to vector<16xf32>
    %83 = vector.shape_cast %82 : vector<16xf32> to vector<16x1xf32>
    %cst_40 = arith.constant 3.200000e+01 : f32
    %84 = vector.broadcast %cst_40 : f32 to vector<16x1xf32>
    %85 = arith.divf %83, %84 : vector<16x1xf32>
    %86 = arith.mulf %77, %77 : vector<16x32xf32>
    %cst_41 = arith.constant dense<0.000000e+00> : vector<16xf32>
    %87 = vector.multi_reduction <add>, %86, %cst_41 [1] : vector<16x32xf32> to vector<16xf32>
    %88 = vector.shape_cast %87 : vector<16xf32> to vector<16x1xf32>
    %cst_42 = arith.constant 3.200000e+01 : f32
    %89 = vector.broadcast %cst_42 : f32 to vector<16x1xf32>
    %90 = arith.divf %88, %89 : vector<16x1xf32>
    %91 = arith.mulf %85, %85 : vector<16x1xf32>
    %92 = arith.subf %90, %91 : vector<16x1xf32>
    %93 = vector.broadcast %85 : vector<16x1xf32> to vector<16x32xf32>
    %94 = arith.subf %77, %93 : vector<16x32xf32>
    %cst_43 = arith.constant 9.99999996E-13 : f32
    %95 = vector.broadcast %cst_43 : f32 to vector<16x1xf32>
    %96 = arith.addf %92, %95 : vector<16x1xf32>
    %97 = math.rsqrt %96 : vector<16x1xf32>
    %98 = vector.broadcast %97 : vector<16x1xf32> to vector<16x32xf32>
    %99 = arith.mulf %94, %98 : vector<16x32xf32>
    %100 = vector.broadcast %79 : vector<1x32xf32> to vector<16x32xf32>
    %101 = arith.mulf %99, %100 : vector<16x32xf32>
    %102 = vector.broadcast %81 : vector<1x32xf32> to vector<16x32xf32>
    %103 = arith.addf %101, %102 : vector<16x32xf32>
    %104 = arith.truncf %103 : vector<16x32xf32> to vector<16x32xbf16>
    %c0_44 = arith.constant 0 : index
    %c0_45 = arith.constant 0 : index
    %c0_46 = arith.constant 0 : index
    %105 = vector.load %arg10[%c0_44, %c0_45, %c0_46] : memref<2x32x64xbf16, #tpu.memory_space<vmem>>, vector<1x32x64xbf16>
    %106 = vector.shape_cast %105 : vector<1x32x64xbf16> to vector<32x64xbf16>
    %cst_47 = arith.constant dense<0.000000e+00> : vector<16x64xf32>
    %107 = tpu.matmul %104, %106, %cst_47 {dimension_numbers = #tpu.dot_dimension_numbers<[1], [0], [0], [1], [0, 0, 1, 1], [], []>} : vector<16x32xbf16>, vector<32x64xbf16>, vector<16x64xf32> -> vector<16x64xf32>
    %c0_48 = arith.constant 0 : index
    %c0_49 = arith.constant 0 : index
    %c0_50 = arith.constant 0 : index
    %108 = vector.load %arg11[%c0_48, %c0_49, %c0_50] : memref<2x1x64xf32, #tpu.memory_space<vmem>>, vector<1x1x64xf32>
    %109 = vector.shape_cast %108 : vector<1x1x64xf32> to vector<1x64xf32>
    %110 = vector.broadcast %109 : vector<1x64xf32> to vector<16x64xf32>
    %111 = arith.addf %107, %110 : vector<16x64xf32>
    %cst_51 = arith.constant 5.000000e-01 : f32
    %112 = vector.broadcast %cst_51 : f32 to vector<16x64xf32>
    %113 = arith.mulf %112, %111 : vector<16x64xf32>
    %cst_52 = arith.constant 4.471500e-02 : f32
    %114 = vector.broadcast %cst_52 : f32 to vector<16x64xf32>
    %115 = arith.mulf %114, %111 : vector<16x64xf32>
    %116 = arith.mulf %115, %111 : vector<16x64xf32>
    %117 = arith.mulf %116, %111 : vector<16x64xf32>
    %118 = arith.addf %111, %117 : vector<16x64xf32>
    %cst_53 = arith.constant 0.797884583 : f32
    %119 = vector.broadcast %cst_53 : f32 to vector<16x64xf32>
    %120 = arith.mulf %119, %118 : vector<16x64xf32>
    %121 = math.tanh %120 : vector<16x64xf32>
    %cst_54 = arith.constant 1.000000e+00 : f32
    %122 = vector.broadcast %cst_54 : f32 to vector<16x64xf32>
    %123 = arith.addf %122, %121 : vector<16x64xf32>
    %124 = arith.mulf %113, %123 : vector<16x64xf32>
    %125 = arith.truncf %124 : vector<16x64xf32> to vector<16x64xbf16>
    %c0_55 = arith.constant 0 : index
    %c0_56 = arith.constant 0 : index
    %c0_57 = arith.constant 0 : index
    %126 = vector.load %arg12[%c0_55, %c0_56, %c0_57] : memref<2x64x32xbf16, #tpu.memory_space<vmem>>, vector<1x64x32xbf16>
    %127 = vector.shape_cast %126 : vector<1x64x32xbf16> to vector<64x32xbf16>
    %cst_58 = arith.constant dense<0.000000e+00> : vector<16x32xf32>
    %128 = tpu.matmul %125, %127, %cst_58 {dimension_numbers = #tpu.dot_dimension_numbers<[1], [0], [0], [1], [0, 0, 1, 1], [], []>} : vector<16x64xbf16>, vector<64x32xbf16>, vector<16x32xf32> -> vector<16x32xf32>
    %c0_59 = arith.constant 0 : index
    %c0_60 = arith.constant 0 : index
    %c0_61 = arith.constant 0 : index
    %129 = vector.load %arg13[%c0_59, %c0_60, %c0_61] : memref<2x1x32xf32, #tpu.memory_space<vmem>>, vector<1x1x32xf32>
    %130 = vector.shape_cast %129 : vector<1x1x32xf32> to vector<1x32xf32>
    %131 = vector.broadcast %130 : vector<1x32xf32> to vector<16x32xf32>
    %132 = arith.addf %128, %131 : vector<16x32xf32>
    %133 = arith.addf %103, %132 : vector<16x32xf32>
    %c0_62 = arith.constant 0 : index
    %c0_63 = arith.constant 0 : index
    %c0_64 = arith.constant 0 : index
    %134 = vector.load %arg14[%c0_62, %c0_63, %c0_64] : memref<2x1x32xf32, #tpu.memory_space<vmem>>, vector<1x1x32xf32>
    %135 = vector.shape_cast %134 : vector<1x1x32xf32> to vector<1x32xf32>
    %c0_65 = arith.constant 0 : index
    %c0_66 = arith.constant 0 : index
    %c0_67 = arith.constant 0 : index
    %136 = vector.load %arg15[%c0_65, %c0_66, %c0_67] : memref<2x1x32xf32, #tpu.memory_space<vmem>>, vector<1x1x32xf32>
    %137 = vector.shape_cast %136 : vector<1x1x32xf32> to vector<1x32xf32>
    %cst_68 = arith.constant dense<0.000000e+00> : vector<16xf32>
    %138 = vector.multi_reduction <add>, %133, %cst_68 [1] : vector<16x32xf32> to vector<16xf32>
    %139 = vector.shape_cast %138 : vector<16xf32> to vector<16x1xf32>
    %cst_69 = arith.constant 3.200000e+01 : f32
    %140 = vector.broadcast %cst_69 : f32 to vector<16x1xf32>
    %141 = arith.divf %139, %140 : vector<16x1xf32>
    %142 = arith.mulf %133, %133 : vector<16x32xf32>
    %cst_70 = arith.constant dense<0.000000e+00> : vector<16xf32>
    %143 = vector.multi_reduction <add>, %142, %cst_70 [1] : vector<16x32xf32> to vector<16xf32>
    %144 = vector.shape_cast %143 : vector<16xf32> to vector<16x1xf32>
    %cst_71 = arith.constant 3.200000e+01 : f32
    %145 = vector.broadcast %cst_71 : f32 to vector<16x1xf32>
    %146 = arith.divf %144, %145 : vector<16x1xf32>
    %147 = arith.mulf %141, %141 : vector<16x1xf32>
    %148 = arith.subf %146, %147 : vector<16x1xf32>
    %149 = vector.broadcast %141 : vector<16x1xf32> to vector<16x32xf32>
    %150 = arith.subf %133, %149 : vector<16x32xf32>
    %cst_72 = arith.constant 9.99999996E-13 : f32
    %151 = vector.broadcast %cst_72 : f32 to vector<16x1xf32>
    %152 = arith.addf %148, %151 : vector<16x1xf32>
    %153 = math.rsqrt %152 : vector<16x1xf32>
    %154 = vector.broadcast %153 : vector<16x1xf32> to vector<16x32xf32>
    %155 = arith.mulf %150, %154 : vector<16x32xf32>
    %156 = vector.broadcast %135 : vector<1x32xf32> to vector<16x32xf32>
    %157 = arith.mulf %155, %156 : vector<16x32xf32>
    %158 = vector.broadcast %137 : vector<1x32xf32> to vector<16x32xf32>
    %159 = arith.addf %157, %158 : vector<16x32xf32>
    %160 = arith.truncf %159 : vector<16x32xf32> to vector<16x32xbf16>
    %c1 = arith.constant 1 : index
    %c0_73 = arith.constant 0 : index
    %c0_74 = arith.constant 0 : index
    %161 = vector.load %arg4[%c1, %c0_73, %c0_74] : memref<2x32x96xbf16, #tpu.memory_space<vmem>>, vector<1x32x96xbf16>
    %162 = vector.shape_cast %161 : vector<1x32x96xbf16> to vector<32x96xbf16>
    %cst_75 = arith.constant dense<0.000000e+00> : vector<16x96xf32>
    %163 = tpu.matmul %160, %162, %cst_75 {dimension_numbers = #tpu.dot_dimension_numbers<[1], [0], [0], [1], [0, 0, 1, 1], [], []>} : vector<16x32xbf16>, vector<32x96xbf16>, vector<16x96xf32> -> vector<16x96xf32>
    %c1_76 = arith.constant 1 : index
    %c0_77 = arith.constant 0 : index
    %c0_78 = arith.constant 0 : index
    %164 = vector.load %arg5[%c1_76, %c0_77, %c0_78] : memref<2x1x96xf32, #tpu.memory_space<vmem>>, vector<1x1x96xf32>
    %165 = vector.shape_cast %164 : vector<1x1x96xf32> to vector<1x96xf32>
    %166 = vector.broadcast %165 : vector<1x96xf32> to vector<16x96xf32>
    %167 = arith.addf %163, %166 : vector<16x96xf32>
    %168 = vector.extract_strided_slice %167 {offsets = [0, 0], sizes = [16, 16], strides = [1, 1]} : vector<16x96xf32> to vector<16x16xf32>
    %169 = vector.extract_strided_slice %167 {offsets = [0, 32], sizes = [16, 16], strides = [1, 1]} : vector<16x96xf32> to vector<16x16xf32>
    %170 = vector.extract_strided_slice %167 {offsets = [0, 64], sizes = [16, 16], strides = [1, 1]} : vector<16x96xf32> to vector<16x16xf32>
    %171 = tpu.transpose %169, [1, 0] : vector<16x16xf32> -> vector<16x16xf32>
    %cst_79 = arith.constant dense<0.000000e+00> : vector<16x16xf32>
    %172 = tpu.matmul %168, %171, %cst_79 {dimension_numbers = #tpu.dot_dimension_numbers<[1], [0], [0], [1], [0, 0, 1, 1], [], []>} : vector<16x16xf32>, vector<16x16xf32>, vector<16x16xf32> -> vector<16x16xf32>
    %173 = arith.addf %172, %25 : vector<16x16xf32>
    %cst_80 = arith.constant dense<0xFF800000> : vector<16xf32>
    %174 = vector.multi_reduction <maximumf>, %173, %cst_80 [1] : vector<16x16xf32> to vector<16xf32>
    %175 = vector.shape_cast %174 : vector<16xf32> to vector<16x1xf32>
    %176 = vector.broadcast %175 : vector<16x1xf32> to vector<16x16xf32>
    %177 = arith.subf %173, %176 : vector<16x16xf32>
    %178 = math.exp %177 : vector<16x16xf32>
    %cst_81 = arith.constant dense<0.000000e+00> : vector<16xf32>
    %179 = vector.multi_reduction <add>, %178, %cst_81 [1] : vector<16x16xf32> to vector<16xf32>
    %180 = vector.shape_cast %179 : vector<16xf32> to vector<16x1xf32>
    %181 = tpu.reciprocal %180 {approx = true} : vector<16x1xf32> -> vector<16x1xf32>
    %182 = vector.broadcast %181 : vector<16x1xf32> to vector<16x16xf32>
    %183 = arith.mulf %178, %182 : vector<16x16xf32>
    %cst_82 = arith.constant dense<0.000000e+00> : vector<16x16xf32>
    %184 = tpu.matmul %183, %170, %cst_82 {dimension_numbers = #tpu.dot_dimension_numbers<[1], [0], [0], [1], [0, 0, 1, 1], [], []>} : vector<16x16xf32>, vector<16x16xf32>, vector<16x16xf32> -> vector<16x16xf32>
    %185 = vector.extract_strided_slice %167 {offsets = [0, 16], sizes = [16, 16], strides = [1, 1]} : vector<16x96xf32> to vector<16x16xf32>
    %186 = vector.extract_strided_slice %167 {offsets = [0, 48], sizes = [16, 16], strides = [1, 1]} : vector<16x96xf32> to vector<16x16xf32>
    %187 = vector.extract_strided_slice %167 {offsets = [0, 80], sizes = [16, 16], strides = [1, 1]} : vector<16x96xf32> to vector<16x16xf32>
    %188 = tpu.transpose %186, [1, 0] : vector<16x16xf32> -> vector<16x16xf32>
    %cst_83 = arith.constant dense<0.000000e+00> : vector<16x16xf32>
    %189 = tpu.matmul %185, %188, %cst_83 {dimension_numbers = #tpu.dot_dimension_numbers<[1], [0], [0], [1], [0, 0, 1, 1], [], []>} : vector<16x16xf32>, vector<16x16xf32>, vector<16x16xf32> -> vector<16x16xf32>
    %190 = arith.addf %189, %25 : vector<16x16xf32>
    %cst_84 = arith.constant dense<0xFF800000> : vector<16xf32>
    %191 = vector.multi_reduction <maximumf>, %190, %cst_84 [1] : vector<16x16xf32> to vector<16xf32>
    %192 = vector.shape_cast %191 : vector<16xf32> to vector<16x1xf32>
    %193 = vector.broadcast %192 : vector<16x1xf32> to vector<16x16xf32>
    %194 = arith.subf %190, %193 : vector<16x16xf32>
    %195 = math.exp %194 : vector<16x16xf32>
    %cst_85 = arith.constant dense<0.000000e+00> : vector<16xf32>
    %196 = vector.multi_reduction <add>, %195, %cst_85 [1] : vector<16x16xf32> to vector<16xf32>
    %197 = vector.shape_cast %196 : vector<16xf32> to vector<16x1xf32>
    %198 = tpu.reciprocal %197 {approx = true} : vector<16x1xf32> -> vector<16x1xf32>
    %199 = vector.broadcast %198 : vector<16x1xf32> to vector<16x16xf32>
    %200 = arith.mulf %195, %199 : vector<16x16xf32>
    %cst_86 = arith.constant dense<0.000000e+00> : vector<16x16xf32>
    %201 = tpu.matmul %200, %187, %cst_86 {dimension_numbers = #tpu.dot_dimension_numbers<[1], [0], [0], [1], [0, 0, 1, 1], [], []>} : vector<16x16xf32>, vector<16x16xf32>, vector<16x16xf32> -> vector<16x16xf32>
    %202 = tpu.concatenate %184, %201 in 1 : vector<16x16xf32>, vector<16x16xf32> -> vector<16x32xf32>
    %203 = arith.truncf %202 : vector<16x32xf32> to vector<16x32xbf16>
    %c1_87 = arith.constant 1 : index
    %c0_88 = arith.constant 0 : index
    %c0_89 = arith.constant 0 : index
    %204 = vector.load %arg6[%c1_87, %c0_88, %c0_89] : memref<2x32x32xbf16, #tpu.memory_space<vmem>>, vector<1x32x32xbf16>
    %205 = vector.shape_cast %204 : vector<1x32x32xbf16> to vector<32x32xbf16>
    %cst_90 = arith.constant dense<0.000000e+00> : vector<16x32xf32>
    %206 = tpu.matmul %203, %205, %cst_90 {dimension_numbers = #tpu.dot_dimension_numbers<[1], [0], [0], [1], [0, 0, 1, 1], [], []>} : vector<16x32xbf16>, vector<32x32xbf16>, vector<16x32xf32> -> vector<16x32xf32>
    %c1_91 = arith.constant 1 : index
    %c0_92 = arith.constant 0 : index
    %c0_93 = arith.constant 0 : index
    %207 = vector.load %arg7[%c1_91, %c0_92, %c0_93] : memref<2x1x32xf32, #tpu.memory_space<vmem>>, vector<1x1x32xf32>
    %208 = vector.shape_cast %207 : vector<1x1x32xf32> to vector<1x32xf32>
    %209 = vector.broadcast %208 : vector<1x32xf32> to vector<16x32xf32>
    %210 = arith.addf %206, %209 : vector<16x32xf32>
    %211 = arith.addf %159, %210 : vector<16x32xf32>
    %c1_94 = arith.constant 1 : index
    %c0_95 = arith.constant 0 : index
    %c0_96 = arith.constant 0 : index
    %212 = vector.load %arg8[%c1_94, %c0_95, %c0_96] : memref<2x1x32xf32, #tpu.memory_space<vmem>>, vector<1x1x32xf32>
    %213 = vector.shape_cast %212 : vector<1x1x32xf32> to vector<1x32xf32>
    %c1_97 = arith.constant 1 : index
    %c0_98 = arith.constant 0 : index
    %c0_99 = arith.constant 0 : index
    %214 = vector.load %arg9[%c1_97, %c0_98, %c0_99] : memref<2x1x32xf32, #tpu.memory_space<vmem>>, vector<1x1x32xf32>
    %215 = vector.shape_cast %214 : vector<1x1x32xf32> to vector<1x32xf32>
    %cst_100 = arith.constant dense<0.000000e+00> : vector<16xf32>
    %216 = vector.multi_reduction <add>, %211, %cst_100 [1] : vector<16x32xf32> to vector<16xf32>
    %217 = vector.shape_cast %216 : vector<16xf32> to vector<16x1xf32>
    %cst_101 = arith.constant 3.200000e+01 : f32
    %218 = vector.broadcast %cst_101 : f32 to vector<16x1xf32>
    %219 = arith.divf %217, %218 : vector<16x1xf32>
    %220 = arith.mulf %211, %211 : vector<16x32xf32>
    %cst_102 = arith.constant dense<0.000000e+00> : vector<16xf32>
    %221 = vector.multi_reduction <add>, %220, %cst_102 [1] : vector<16x32xf32> to vector<16xf32>
    %222 = vector.shape_cast %221 : vector<16xf32> to vector<16x1xf32>
    %cst_103 = arith.constant 3.200000e+01 : f32
    %223 = vector.broadcast %cst_103 : f32 to vector<16x1xf32>
    %224 = arith.divf %222, %223 : vector<16x1xf32>
    %225 = arith.mulf %219, %219 : vector<16x1xf32>
    %226 = arith.subf %224, %225 : vector<16x1xf32>
    %227 = vector.broadcast %219 : vector<16x1xf32> to vector<16x32xf32>
    %228 = arith.subf %211, %227 : vector<16x32xf32>
    %cst_104 = arith.constant 9.99999996E-13 : f32
    %229 = vector.broadcast %cst_104 : f32 to vector<16x1xf32>
    %230 = arith.addf %226, %229 : vector<16x1xf32>
    %231 = math.rsqrt %230 : vector<16x1xf32>
    %232 = vector.broadcast %231 : vector<16x1xf32> to vector<16x32xf32>
    %233 = arith.mulf %228, %232 : vector<16x32xf32>
    %234 = vector.broadcast %213 : vector<1x32xf32> to vector<16x32xf32>
    %235 = arith.mulf %233, %234 : vector<16x32xf32>
    %236 = vector.broadcast %215 : vector<1x32xf32> to vector<16x32xf32>
    %237 = arith.addf %235, %236 : vector<16x32xf32>
    %238 = arith.truncf %237 : vector<16x32xf32> to vector<16x32xbf16>
    %c1_105 = arith.constant 1 : index
    %c0_106 = arith.constant 0 : index
    %c0_107 = arith.constant 0 : index
    %239 = vector.load %arg10[%c1_105, %c0_106, %c0_107] : memref<2x32x64xbf16, #tpu.memory_space<vmem>>, vector<1x32x64xbf16>
    %240 = vector.shape_cast %239 : vector<1x32x64xbf16> to vector<32x64xbf16>
    %cst_108 = arith.constant dense<0.000000e+00> : vector<16x64xf32>
    %241 = tpu.matmul %238, %240, %cst_108 {dimension_numbers = #tpu.dot_dimension_numbers<[1], [0], [0], [1], [0, 0, 1, 1], [], []>} : vector<16x32xbf16>, vector<32x64xbf16>, vector<16x64xf32> -> vector<16x64xf32>
    %c1_109 = arith.constant 1 : index
    %c0_110 = arith.constant 0 : index
    %c0_111 = arith.constant 0 : index
    %242 = vector.load %arg11[%c1_109, %c0_110, %c0_111] : memref<2x1x64xf32, #tpu.memory_space<vmem>>, vector<1x1x64xf32>
    %243 = vector.shape_cast %242 : vector<1x1x64xf32> to vector<1x64xf32>
    %244 = vector.broadcast %243 : vector<1x64xf32> to vector<16x64xf32>
    %245 = arith.addf %241, %244 : vector<16x64xf32>
    %cst_112 = arith.constant 5.000000e-01 : f32
    %246 = vector.broadcast %cst_112 : f32 to vector<16x64xf32>
    %247 = arith.mulf %246, %245 : vector<16x64xf32>
    %cst_113 = arith.constant 4.471500e-02 : f32
    %248 = vector.broadcast %cst_113 : f32 to vector<16x64xf32>
    %249 = arith.mulf %248, %245 : vector<16x64xf32>
    %250 = arith.mulf %249, %245 : vector<16x64xf32>
    %251 = arith.mulf %250, %245 : vector<16x64xf32>
    %252 = arith.addf %245, %251 : vector<16x64xf32>
    %cst_114 = arith.constant 0.797884583 : f32
    %253 = vector.broadcast %cst_114 : f32 to vector<16x64xf32>
    %254 = arith.mulf %253, %252 : vector<16x64xf32>
    %255 = math.tanh %254 : vector<16x64xf32>
    %cst_115 = arith.constant 1.000000e+00 : f32
    %256 = vector.broadcast %cst_115 : f32 to vector<16x64xf32>
    %257 = arith.addf %256, %255 : vector<16x64xf32>
    %258 = arith.mulf %247, %257 : vector<16x64xf32>
    %259 = arith.truncf %258 : vector<16x64xf32> to vector<16x64xbf16>
    %c1_116 = arith.constant 1 : index
    %c0_117 = arith.constant 0 : index
    %c0_118 = arith.constant 0 : index
    %260 = vector.load %arg12[%c1_116, %c0_117, %c0_118] : memref<2x64x32xbf16, #tpu.memory_space<vmem>>, vector<1x64x32xbf16>
    %261 = vector.shape_cast %260 : vector<1x64x32xbf16> to vector<64x32xbf16>
    %cst_119 = arith.constant dense<0.000000e+00> : vector<16x32xf32>
    %262 = tpu.matmul %259, %261, %cst_119 {dimension_numbers = #tpu.dot_dimension_numbers<[1], [0], [0], [1], [0, 0, 1, 1], [], []>} : vector<16x64xbf16>, vector<64x32xbf16>, vector<16x32xf32> -> vector<16x32xf32>
    %c1_120 = arith.constant 1 : index
    %c0_121 = arith.constant 0 : index
    %c0_122 = arith.constant 0 : index
    %263 = vector.load %arg13[%c1_120, %c0_121, %c0_122] : memref<2x1x32xf32, #tpu.memory_space<vmem>>, vector<1x1x32xf32>
    %264 = vector.shape_cast %263 : vector<1x1x32xf32> to vector<1x32xf32>
    %265 = vector.broadcast %264 : vector<1x32xf32> to vector<16x32xf32>
    %266 = arith.addf %262, %265 : vector<16x32xf32>
    %267 = arith.addf %237, %266 : vector<16x32xf32>
    %c1_123 = arith.constant 1 : index
    %c0_124 = arith.constant 0 : index
    %c0_125 = arith.constant 0 : index
    %268 = vector.load %arg14[%c1_123, %c0_124, %c0_125] : memref<2x1x32xf32, #tpu.memory_space<vmem>>, vector<1x1x32xf32>
    %269 = vector.shape_cast %268 : vector<1x1x32xf32> to vector<1x32xf32>
    %c1_126 = arith.constant 1 : index
    %c0_127 = arith.constant 0 : index
    %c0_128 = arith.constant 0 : index
    %270 = vector.load %arg15[%c1_126, %c0_127, %c0_128] : memref<2x1x32xf32, #tpu.memory_space<vmem>>, vector<1x1x32xf32>
    %271 = vector.shape_cast %270 : vector<1x1x32xf32> to vector<1x32xf32>
    %cst_129 = arith.constant dense<0.000000e+00> : vector<16xf32>
    %272 = vector.multi_reduction <add>, %267, %cst_129 [1] : vector<16x32xf32> to vector<16xf32>
    %273 = vector.shape_cast %272 : vector<16xf32> to vector<16x1xf32>
    %cst_130 = arith.constant 3.200000e+01 : f32
    %274 = vector.broadcast %cst_130 : f32 to vector<16x1xf32>
    %275 = arith.divf %273, %274 : vector<16x1xf32>
    %276 = arith.mulf %267, %267 : vector<16x32xf32>
    %cst_131 = arith.constant dense<0.000000e+00> : vector<16xf32>
    %277 = vector.multi_reduction <add>, %276, %cst_131 [1] : vector<16x32xf32> to vector<16xf32>
    %278 = vector.shape_cast %277 : vector<16xf32> to vector<16x1xf32>
    %cst_132 = arith.constant 3.200000e+01 : f32
    %279 = vector.broadcast %cst_132 : f32 to vector<16x1xf32>
    %280 = arith.divf %278, %279 : vector<16x1xf32>
    %281 = arith.mulf %275, %275 : vector<16x1xf32>
    %282 = arith.subf %280, %281 : vector<16x1xf32>
    %283 = vector.broadcast %275 : vector<16x1xf32> to vector<16x32xf32>
    %284 = arith.subf %267, %283 : vector<16x32xf32>
    %cst_133 = arith.constant 9.99999996E-13 : f32
    %285 = vector.broadcast %cst_133 : f32 to vector<16x1xf32>
    %286 = arith.addf %282, %285 : vector<16x1xf32>
    %287 = math.rsqrt %286 : vector<16x1xf32>
    %288 = vector.broadcast %287 : vector<16x1xf32> to vector<16x32xf32>
    %289 = arith.mulf %284, %288 : vector<16x32xf32>
    %290 = vector.broadcast %269 : vector<1x32xf32> to vector<16x32xf32>
    %291 = arith.mulf %289, %290 : vector<16x32xf32>
    %292 = vector.broadcast %271 : vector<1x32xf32> to vector<16x32xf32>
    %293 = arith.addf %291, %292 : vector<16x32xf32>
    %294 = vector.shape_cast %293 : vector<16x32xf32> to vector<2x8x32xf32>
    %295 = vector.extract_strided_slice %294 {offsets = [0, 0, 0], sizes = [2, 1, 32], strides = [1, 1, 1]} : vector<2x8x32xf32> to vector<2x1x32xf32>
    %296 = vector.shape_cast %295 : vector<2x1x32xf32> to vector<2x32xf32>
    %c0_134 = arith.constant 0 : index
    %c0_135 = arith.constant 0 : index
    %297 = vector.load %arg16[%c0_134, %c0_135] : memref<32x32xf32, #tpu.memory_space<vmem>>, vector<32x32xf32>
    %cst_136 = arith.constant dense<0.000000e+00> : vector<2x32xf32>
    %298 = tpu.matmul %296, %297, %cst_136 {dimension_numbers = #tpu.dot_dimension_numbers<[1], [0], [0], [1], [0, 0, 1, 1], [], []>} : vector<2x32xf32>, vector<32x32xf32>, vector<2x32xf32> -> vector<2x32xf32>
    %c0_137 = arith.constant 0 : index
    %c0_138 = arith.constant 0 : index
    %299 = vector.load %arg17[%c0_137, %c0_138] : memref<1x32xf32, #tpu.memory_space<vmem>>, vector<1x32xf32>
    %300 = vector.broadcast %299 : vector<1x32xf32> to vector<2x32xf32>
    %301 = arith.addf %298, %300 : vector<2x32xf32>
    %302 = math.tanh %301 : vector<2x32xf32>
    %c0_139 = arith.constant 0 : index
    %c0_140 = arith.constant 0 : index
    %303 = vector.load %arg18[%c0_139, %c0_140] : memref<32x3xf32, #tpu.memory_space<vmem>>, vector<32x3xf32>
    %cst_141 = arith.constant dense<0.000000e+00> : vector<2x3xf32>
    %304 = tpu.matmul %302, %303, %cst_141 {dimension_numbers = #tpu.dot_dimension_numbers<[1], [0], [0], [1], [0, 0, 1, 1], [], []>} : vector<2x32xf32>, vector<32x3xf32>, vector<2x3xf32> -> vector<2x3xf32>
    %c0_142 = arith.constant 0 : index
    %c0_143 = arith.constant 0 : index
    %305 = vector.load %arg19[%c0_142, %c0_143] : memref<1x3xf32, #tpu.memory_space<vmem>>, vector<1x3xf32>
    %306 = vector.broadcast %305 : vector<1x3xf32> to vector<2x3xf32>
    %307 = arith.addf %304, %306 : vector<2x3xf32>
    %c0_144 = arith.constant 0 : index
    %c0_145 = arith.constant 0 : index
    %308 = vector.load %arg20[%c0_144, %c0_145] : memref<2x3xf32, #tpu.memory_space<vmem>>, vector<2x3xf32>
    tpu.vector_store %arg20[%c0_144, %c0_145], %307 {strides = array<i32>} : memref<2x3xf32, #tpu.memory_space<vmem>>, vector<2x3xf32>,
    return
  }
}

</mosaic_0001>

<bundles_post_ra>
// kernel: mul.8
= control target key start
LH: loop header
LB: loop body
LE: loop exit
PB: predicated region body
PF: predicated region fallthrough
CT: control target
= control target key end

     0   :  { %vm8_vm0 = vcmask 64512   ;;  %vm14_vm1 = vcmask 130112   ;;  %s42_s0 = inlined_call_operand.vmem [shape: f32[2,8], index: 0, kind: input, shape index: {}]   ;;  %s43_s1 = inlined_call_operand.vmem [shape: f32[16], index: 1, kind: output, shape index: {}]  }
   0x1   :  { %v5_v0 = vld [vmem:[%s42_s0] sm:$0x3]  ;;  %s25_s0 = smov 8  }
   0x2   :  { %6 = vst [vmem:[#allocation1] sm:$0x3] %v5_v0 }
   0x9   :  { %v11_v1 = vld [vmem:[#allocation1 + $0x1] sm:$0x1]   ;;  %v7_v2 = vld [vmem:[#allocation1] sm:$0x1]  }
   0xa   :  { %12 = vrot.lane.b32.xlu0 %v11_v1, %s25_s0  ;;  %9 = vst.msk [vmem:[#allocation0] sm:$0x1] %vm8_vm0, %v7_v2  }
  0x7c   :  { %v13_v3 = vpop.permute.xlu0 %12  }
  0x7d   :  { %15 = vst.msk [vmem:[#allocation0] sm:$0x1] %vm14_vm1, %v13_v3  }
  0x84   :  { %v20_v4 = vld [vmem:[#allocation0] sm:$0x1] }
  0x85   :  { %23 = vst [vmem:[%s43_s1] sm:$0x1] %v20_v4 }

// kernel: bert_classifier_forward.1
= control target key start
LH: loop header
LB: loop body
LE: loop exit
PB: predicated region body
PF: predicated region fallthrough
CT: control target
= control target key end

     0   :  { %s2874_s0 = inlined_call_operand.vmem [shape: f32[16,32], index: 0, kind: input, shape index: {}]   ;;  %s2875_s1 = inlined_call_operand.vmem [shape: f32[16,16], index: 1, kind: input, shape index: {}]   ;;  %s2876_s2 = inlined_call_operand.vmem [shape: f32[1,32], index: 2, kind: input, shape index: {}]   ;;  %s2877_s3 = inlined_call_operand.vmem [shape: f32[1,32], index: 3, kind: input, shape index: {}]   ;;  %s2878_s4 = inlined_call_operand.vmem [shape: bf16[2,32,96], index: 4, kind: input, shape index: {}]   ;;  %s2879_s5 = inlined_call_operand.vmem [shape: f32[2,1,96], index: 5, kind: input, shape index: {}]   ;;  %s2880_s6 = inlined_call_operand.vmem [shape: bf16[2,32,32], index: 6, kind: input, shape index: {}]   ;;  %s2881_s7 = inlined_call_operand.vmem [shape: f32[2,1,32], index: 7, kind: input, shape index: {}]   ;;  %s2882_s8 = inlined_call_operand.vmem [shape: f32[2,1,32], index: 8, kind: input, shape index: {}]   ;;  %s2883_s9 = inlined_call_operand.vmem [shape: f32[2,1,32], index: 9, kind: input, shape index: {}]   ;;  %s2884_s10 = inlined_call_operand.vmem [shape: bf16[2,32,64], index: 10, kind: input, shape index: {}]   ;;  %s2885_s11 = inlined_call_operand.vmem [shape: f32[2,1,64], index: 11, kind: input, shape index: {}]   ;;  %s2886_s12 = inlined_call_operand.vmem [shape: bf16[2,64,32], index: 12, kind: input, shape index: {}]   ;;  %s2887_s13 = inlined_call_operand.vmem [shape: f32[2,1,32], index: 13, kind: input, shape index: {}]   ;;  %s2888_s14 = inlined_call_operand.vmem [shape: f32[2,1,32], index: 14, kind: input, shape index: {}]   ;;  %s2889_s15 = inlined_call_operand.vmem [shape: f32[2,1,32], index: 15, kind: input, shape index: {}]   ;;  %s2890_s16 = inlined_call_operand.vmem [shape: f32[32,32], index: 16, kind: input, shape index: {}]   ;;  %s2891_s17 = inlined_call_operand.vmem [shape: f32[1,32], index: 17, kind: input, shape index: {}]   ;;  %s2892_s18 = inlined_call_operand.vmem [shape: f32[32,3], index: 18, kind: input, shape index: {}]   ;;  %s2893_s19 = inlined_call_operand.vmem [shape: f32[1,3], index: 19, kind: input, shape index: {}]   ;;  %s2894_s20 = inlined_call_operand.hbm [shape: f32[2,3], index: 20, kind: output, shape index: {}]  }
   0x1   :  { %2898 = sst [smem:[#allocation5_spill]] %s2874_s0 }
   0x2   :  { %2899 = sst [smem:[#allocation6_spill]] %s2875_s1 }
   0x3   :  { %2900 = sst [smem:[#allocation7_spill]] %s2876_s2 }
   0x4   :  { %2901 = sst [smem:[#allocation8_spill]] %s2877_s3 }
   0x5   :  { %2902 = sst [smem:[#allocation9_spill]] %s2878_s4 }
   0x6   :  { %s2903_s23 = sld [smem:[#allocation5_spill]]  ;;  %vm71_vm0 = vcmask 261120  }
   0xc   :  { %v67_v0 = vld [vmem:[%s2903_s23] sm:$0xff]  ;;  %v68_v1 = vld [vmem:[%s2903_s23 + $0x8] sm:$0xff] }
   0xd   :  { %v72_v2 = vsel %vm71_vm0, %v67_v0, 0.0  ;;  %v81_v3 = vmul.f32 %v67_v0, %v67_v0  ;;  %v75_v4 = vsel %vm71_vm0, %v68_v1, 0.0  ;;  %v82_v5 = vmul.f32 %v68_v1, %v68_v1 }
   0xe   :  { %73 = vadd.xlane.f32.xlu0 %v72_v2 }
   0xf   :  { %v83_v6 = vsel %vm71_vm0, %v81_v3, 0.0  ;;  %v86_v7 = vsel %vm71_vm0, %v82_v5, 0.0 }
  0x10   :  { %84 = vadd.xlane.f32.xlu1 %v83_v6 }
  0x12   :  { %76 = vadd.xlane.f32.xlu0 %v75_v4 }
  0x14   :  { %87 = vadd.xlane.f32.xlu1 %v86_v7 }
  0x15   :  { %25 = vsyncpa [#allocation3], 0  ;;  %s2904_s26 = sld [smem:[#allocation9_spill]]  ;;  %v2397_v9 = vmov 0.0   ;;  %vm2398_vm1 = vmmov 0   ;;  %vm195_vm2 = vcmask 130048  }
  0x16   :  { %2124 = vmatprep.subr.bf16.mxu0 %v2397_v9  ;;  %2128 = vmatprep.mubr.msk.bf16.mxu0 %vm2398_vm1, %v2397_v9  ;;  %s2905_s30 = sld [smem:[#allocation7_spill]]  ;;  %v1954_v38 = vld [vmem:[%s2879_s5] ss:$0 sm:$0xff]  ;;  %s2399_s24 = smov 96   ;;  %vm842_vm3 = vcmask 523264   ;;  %vm1777_vm4 = vcmask 1041409  }
  0x17   :  { %s2906_s1 = sld [smem:[#allocation8_spill]]  ;;  %s2400_s2 = smov 80   ;;  %vm1936_vm5 = vcmask 17408  }
  0x18   :  { %s2401_s25 = smov 112   ;;  %s2907_s28 = sld [smem:[#allocation6_spill]] }
  0x19   :  { %s2403_s0 = smov 48   ;;  %s2404_s3 = smov 16  }
  0x1b   :  { %v2293_v8 = vld [vmem:[%s2904_s26 + $0x8] sm:$0xff]   ;;  %v2294_v10 = vld [vmem:[%s2904_s26] sm:$0xff]  }
  0x1c   :  { %2125 = vmatpush3.bf16.msra.mxu0 %v2293_v8  ;;  %v1952_v28 = vld [vmem:[%s2905_s30] ss:$0 sm:$0xff]  ;;  %s2402_s30 = smov 64  }
  0x1d   :  { %2126 = vmatprep.subr.bf16.mxu0 %v2397_v9  ;;  %v1953_v33 = vld [vmem:[%s2906_s1] ss:$0 sm:$0xff] }
  0x1e   :  { %v2583_v51 = vld [vmem:[%s2907_s28 + $0x8] sm:$0xff]  ;;  %v2588_v54 = vld [vmem:[%s2907_s28] sm:$0xff] }
  0x20   :  { %2127 = vmatpush3.bf16.msra.mxu0 %v2294_v10 }
  0x97   :  { %v74_v11 = vpop.xlane.xlu0 %73 }
  0x98   :  { %v79_v12 = vmul.f32 0.03125, %v74_v11 }
  0x99   :  { %v85_v13 = vpop.xlane.xlu1 %84 }
  0x9a   :  { %v91_v14 = vmul.f32 %v79_v12, %v79_v12  ;;  %v89_v15 = vmul.f32 0.03125, %v85_v13  ;;  %v95_v25 = vsub.f32 %v67_v0, %v79_v12 }
  0x9b   :  { %v77_v16 = vpop.xlane.xlu0 %76 }
  0x9c   :  { %v93_v17 = vsub.f32 %v89_v15, %v91_v14  ;;  %v80_v18 = vmul.f32 0.03125, %v77_v16 }
  0x9d   :  { %v88_v19 = vpop.xlane.xlu1 %87 }
  0x9e   :  { %v97_v20 = vadd.f32 1e-12, %v93_v17  ;;  %v92_v21 = vmul.f32 %v80_v18, %v80_v18  ;;  %v90_v22 = vmul.f32 0.03125, %v88_v19  ;;  %v96_v29 = vsub.f32 %v68_v1, %v80_v18 }
  0xa0   :  { %2313 = vrsqrt.f32 %v97_v20  ;;  %v94_v23 = vsub.f32 %v90_v22, %v92_v21 }
  0xa2   :  { %v98_v24 = vadd.f32 1e-12, %v94_v23 }
  0xa4   :  { %2315 = vrsqrt.f32 %v98_v24 }
  0xad   :  { %v2314_v26 = vpop.eup %2313 }
  0xae   :  { %v101_v27 = vmul.f32 %v2314_v26, %v95_v25 }
  0xb0   :  { %v109_v32 = vmul.f32 %v1952_v28, %v101_v27 }
  0xb1   :  { %v2316_v30 = vpop.eup %2315 }
  0xb2   :  { %v102_v31 = vmul.f32 %v2316_v30, %v96_v29  ;;  %v2537_v35 = vadd.f32 %v1953_v33, %v109_v32 }
  0xb4   :  { %v110_v34 = vmul.f32 %v1952_v28, %v102_v31 }
  0xb6   :  { %v2539_v36 = vadd.f32 %v1953_v33, %v110_v34 }
  0xb8   :  { %v121_v37 = vpack.c.bf16 %v2539_v36, %v2537_v35 }
  0xba   :  { %2129 = vmatmul.mubr.msk.bf16.vlgmr.msra.gmra.mxu0 %vm71_vm0, %v121_v37 }
 0x17a   :  { %v182_v39 = vpop.f32.mrf.mxu0 }
 0x17b   :  { %v2547_v40 = vadd.f32 %v1954_v38, %v182_v39 }
 0x17c   :  { %v2130_v41 = vpop.f32.mrf.mxu0 }
 0x17d   :  { %191 = vrot.lane.b32.xlu1 %v2547_v40, %s2399_s24  ;;  %2136 = vmatprep.mubr.msk.f32.mxu1 %vm195_vm2, %v2547_v40  ;;  %v2296_v41 = vld [vmem:[%s2880_s6] sm:$0xff]  }
 0x17e   :  { %v185_v42 = vpop.f32.mrf.mxu0 }
 0x17f   :  { %v2553_v43 = vadd.f32 %v1954_v38, %v185_v42 }
 0x180   :  { %v2131_v44 = vpop.f32.mrf.mxu0 }
 0x181   :  { %394 = vrot.lane.b32.xlu1 %v2553_v43, %s2400_s2  ;;  %193 = vrot.lane.b32.xlu0 %v2553_v43, %s2399_s24 }
 0x185   :  { %392 = vrot.lane.b32.xlu1 %v2547_v40, %s2400_s2  ;;  %388 = vrot.lane.b32.xlu0 %v2547_v40, %s2401_s25 }
 0x189   :  { %390 = vrot.lane.b32.xlu1 %v2553_v43, %s2401_s25 }
 0x1ef   :  { %v192_v45 = vpop.permute.xlu1 %191 }
 0x1f3   :  { %v395_v46 = vpop.permute.xlu1 %394  ;;  %v194_v47 = vpop.permute.xlu0 %193 }
 0x1f4   :  { %2132 = vmatprep.subr.msk.mxu1 %vm195_vm2, %v194_v47  ;;  %2146 = vmatprep.subr.msk.mxu0 %vm195_vm2, %v395_v46 }
 0x1f5   :  { %2133 = vmatpush3.xpose.msk.msra.mxu1 %vm195_vm2, %v194_v47  ;;  %2147 = vmatpush3.xpose.msk.msra.mxu0 %vm195_vm2, %v395_v46 }
 0x1f6   :  { %2134 = vmatprep.subr.msk.mxu1 %vm195_vm2, %v192_v45 }
 0x1f7   :  { %v393_v48 = vpop.permute.xlu1 %392  ;;  %v389_v49 = vpop.permute.xlu0 %388 }
 0x1f8   :  { %2148 = vmatprep.subr.msk.mxu0 %vm195_vm2, %v393_v48  ;;  %2150 = vmatprep.mubr.msk.f32.mxu0 %vm195_vm2, %v389_v49 }
 0x1f9   :  { %2135 = vmatpush3.xpose.msk.msra.mxu1 %vm195_vm2, %v192_v45  ;;  %2149 = vmatpush3.xpose.msk.msra.mxu0 %vm195_vm2, %v393_v48 }
 0x1fa   :  { %2160 = vmatprep.subr.bf16.mxu0 %v2397_v9 }
 0x1fb   :  { %v391_v50 = vpop.permute.xlu1 %390 }
 0x1fc   :  { %2137 = vmatmul.mubr.msk.f32.vlgmr.msra.gmra.mxu1 %vm195_vm2, %v2553_v43  ;;  %2151 = vmatmul.mubr.msk.f32.vlgmr.msra.gmra.mxu0 %vm195_vm2, %v391_v50 }
 0x1fd   :  { %2164 = vmatprep.mubr.msk.bf16.mxu0 %vm2398_vm1, %v2397_v9 }
 0x2bc   :  { %v2138_v52 = vpop.f32.mrf.mxu1  ;;  %v2152_v53 = vpop.f32.mrf.mxu0 }
 0x2bd   :  { %v276_v55 = vadd.f32 %v2138_v52, %v2583_v51  ;;  %v476_v62 = vadd.f32 %v2152_v53, %v2583_v51 }
 0x2be   :  { %v270_v56 = vpop.f32.mrf.mxu1  ;;  %v470_v57 = vpop.f32.mrf.mxu0 }
 0x2bf   :  { %v271_v58 = vadd.f32 %v270_v56, %v2588_v54  ;;  %v282_v59 = vsel %vm195_vm2, %v276_v55, -inf  ;;  %v471_v60 = vadd.f32 %v470_v57, %v2588_v54  ;;  %v482_v0 = vsel %vm195_vm2, %v476_v62, -inf }
 0x2c0   :  { %283 = vmax.xlane.f32.xlu1 %v282_v59 }
 0x2c1   :  { %v279_v61 = vsel %vm195_vm2, %v271_v58, -inf  ;;  %v479_v63 = vsel %vm195_vm2, %v471_v60, -inf }
 0x2c2   :  { %280 = vmax.xlane.f32.xlu0 %v279_v61 }
 0x2c6   :  { %480 = vmax.xlane.f32.xlu0 %v479_v63 }
 0x2ca   :  { %483 = vmax.xlane.f32.xlu0 %v482_v0 }
 0x349   :  { %v284_v1 = vpop.xlane.xlu1 %283 }
 0x34a   :  { %v286_v2 = vsub.f32 %v276_v55, %v284_v1  ;;  %v1970_v55 = vld [vmem:[%s2881_s7] ss:$0 sm:$0xff] }
 0x34b   :  { %v281_v3 = vpop.xlane.xlu0 %280 }
 0x34c   :  { %v289_v4 = vmul.f32 1.442695, %v286_v2  ;;  %v285_v5 = vsub.f32 %v271_v58, %v281_v3 }
 0x34e   :  { %2317 = vpow2.f32 %v289_v4  ;;  %v287_v6 = vmul.f32 1.442695, %v285_v5 }
 0x34f   :  { %v481_v7 = vpop.xlane.xlu0 %480 }
 0x350   :  { %2319 = vpow2.f32 %v287_v6  ;;  %v485_v8 = vsub.f32 %v471_v60, %v481_v7  ;;  %v2298_v6 = vld [vmem:[%s2884_s10] sm:$0xff]  }
 0x352   :  { %v487_v10 = vmul.f32 1.442695, %v485_v8 }
 0x353   :  { %v484_v11 = vpop.xlane.xlu0 %483 }
 0x354   :  { %2321 = vpow2.f32 %v487_v10  ;;  %v486_v12 = vsub.f32 %v476_v62, %v484_v11 }
 0x356   :  { %v489_v13 = vmul.f32 1.442695, %v486_v12 }
 0x358   :  { %2323 = vpow2.f32 %v489_v13 }
 0x35b   :  { %v2318_v14 = vpop.eup %2317 }
 0x35c   :  { %v294_v15 = vsel %vm195_vm2, %v2318_v14, 0.0 }
 0x35d   :  { %v2320_v16 = vpop.eup %2319  ;;  %295 = vadd.xlane.f32.xlu1 %v294_v15 }
 0x35e   :  { %v291_v17 = vsel %vm195_vm2, %v2320_v16, 0.0 }
 0x35f   :  { %292 = vadd.xlane.f32.xlu0 %v291_v17 }
 0x361   :  { %v2322_v18 = vpop.eup %2321 }
 0x362   :  { %v491_v19 = vsel %vm195_vm2, %v2322_v18, 0.0 }
 0x363   :  { %492 = vadd.xlane.f32.xlu0 %v491_v19 }
 0x365   :  { %v2324_v20 = vpop.eup %2323 }
 0x366   :  { %v494_v21 = vsel %vm195_vm2, %v2324_v20, 0.0 }
 0x367   :  { %495 = vadd.xlane.f32.xlu1 %v494_v21 }
 0x378   :  { %301 = vrot.lane.b32.xlu1 %v2547_v40, %s2402_s30 }
 0x379   :  { %303 = vrot.lane.b32.xlu0 %v2553_v43, %s2402_s30 }
 0x37c   :  { %503 = vrot.lane.b32.xlu1 %v2553_v43, %s2403_s0 }
 0x380   :  { %501 = vrot.lane.b32.xlu1 %v2547_v40, %s2403_s0  ;;  %v2295_v40 = vld [vmem:[%s2880_s6 + $0x8] sm:$0xff]  }
 0x381   :  { %2161 = vmatpush3.bf16.msra.mxu0 %v2295_v40  ;;  %v1976_v40 = vld [vmem:[%s2885_s11] ss:$0 sm:$0xff] }
 0x382   :  { %2162 = vmatprep.subr.bf16.mxu0 %v2397_v9 }
 0x385   :  { %2163 = vmatpush3.bf16.msra.mxu0 %v2296_v41 }
 0x386   :  { %2176 = vmatprep.subr.bf16.mxu0 %v2397_v9 }
 0x3e6   :  { %v296_v22 = vpop.xlane.xlu1 %295 }
 0x3e7   :  { %2325 = vrcp.f32 %v296_v22 }
 0x3e8   :  { %v293_v23 = vpop.xlane.xlu0 %292 }
 0x3e9   :  { %2327 = vrcp.f32 %v293_v23 }
 0x3ec   :  { %v493_v24 = vpop.xlane.xlu0 %492 }
 0x3ed   :  { %2329 = vrcp.f32 %v493_v24  ;;  %v1974_v24 = vld [vmem:[%s2882_s8] ss:$0 sm:$0xff] }
 0x3f0   :  { %v496_v25 = vpop.xlane.xlu1 %495  ;;  %v304_v26 = vpop.permute.xlu0 %303 }
 0x3f1   :  { %2331 = vrcp.f32 %v496_v25  ;;  %2139 = vmatprep.subr.mxu1 %v304_v26 }
 0x3f2   :  { %2140 = vmatpush3.msra.mxu1 %v304_v26 }
 0x3f4   :  { %v302_v27 = vpop.permute.xlu1 %301  ;;  %v2326_v28 = vpop.eup %2325 }
 0x3f5   :  { %2141 = vmatprep.subr.mxu1 %v302_v27  ;;  %v300_v32 = vmul.f32 %v2326_v28, %v2318_v14 }
 0x3f6   :  { %v2328_v29 = vpop.eup %2327  ;;  %2142 = vmatpush3.msra.mxu1 %v302_v27 }
 0x3f7   :  { %v299_v30 = vmul.f32 %v2328_v29, %v2320_v16  ;;  %v1975_v29 = vld [vmem:[%s2883_s9] ss:$0 sm:$0xff] }
 0x3f8   :  { %v504_v31 = vpop.permute.xlu1 %503 }
 0x3f9   :  { %2143 = vmatprep.mubr.msk.f32.mxu1 %vm195_vm2, %v299_v30  ;;  %2153 = vmatprep.subr.mxu1 %v504_v31 }
 0x3fa   :  { %v2330_v33 = vpop.eup %2329  ;;  %2144 = vmatmul.mubr.msk.f32.vlgmr.msra.gmra.mxu1 %vm195_vm2, %v300_v32 }
 0x3fb   :  { %2154 = vmatpush3.msra.mxu1 %v504_v31  ;;  %v499_v34 = vmul.f32 %v2330_v33, %v2322_v18 }
 0x3fc   :  { %v502_v37 = vpop.permute.xlu1 %501 }
 0x3fd   :  { %2155 = vmatprep.subr.mxu1 %v502_v37  ;;  %2157 = vmatprep.mubr.msk.f32.mxu1 %vm195_vm2, %v499_v34  ;;  %v2299_v34 = vld [vmem:[%s2886_s12 + $0x18] sm:$0xff]  }
 0x3fe   :  { %v2332_v38 = vpop.eup %2331  ;;  %2156 = vmatpush3.msra.mxu1 %v502_v37  ;;  %v2300_v37 = vld [vmem:[%s2886_s12 + $0x10] sm:$0xff]  }
 0x3ff   :  { %v500_v39 = vmul.f32 %v2332_v38, %v2324_v20  ;;  %2168 = vmatprep.subr.bf16.mxu1 %v2397_v9  ;;  %v2301_v38 = vld [vmem:[%s2886_s12 + $0x8] sm:$0xff]  }
 0x401   :  { %2158 = vmatmul.mubr.msk.f32.vlgmr.msra.gmra.mxu1 %vm195_vm2, %v500_v39  ;;  %v2302_v39 = vld [vmem:[%s2886_s12] sm:$0xff]  }
 0x402   :  { %2172 = vmatprep.mubr.msk.bf16.mxu1 %vm2398_vm1, %v2397_v9 }
 0x4ba   :  { %v2145_v42 = vpop.f32.mrf.mxu1 }
 0x4bc   :  { %v379_v43 = vpop.f32.mrf.mxu1 }
 0x4c1   :  { %v2159_v44 = vpop.f32.mrf.mxu1 }
 0x4c3   :  { %v579_v45 = vpop.f32.mrf.mxu1 }
 0x4c4   :  { %v2283_v46 = vpack.i.bf16 %v2159_v44, %v579_v45 }
 0x4c6   :  { %2284 = vrot.lane.b32.xlu0 %v2283_v46, %s2404_s3 }
 0x538   :  { %v2285_v47 = vpop.permute.xlu0 %2284 }
 0x539   :  { %v2287_v48 = vunpack.i.h.bf16 %v2285_v47  ;;  %v2286_v49 = vunpack.i.l.bf16 %v2285_v47 }
 0x53b   :  { %v597_v50 = vsel %vm195_vm2, %v2145_v42, %v2287_v48  ;;  %v596_v52 = vsel %vm195_vm2, %v379_v43, %v2286_v49 }
 0x53c   :  { %v598_v53 = vpack.c.bf16 %v597_v50, %v596_v52 }
 0x53e   :  { %2165 = vmatmul.mubr.msk.bf16.vlgmr.msra.gmra.mxu0 %vm71_vm0, %v598_v53 }
 0x53f   :  { %2184 = vmatprep.mubr.msk.bf16.mxu0 %vm2398_vm1, %v2397_v9  ;;  %2177 = vmatpush3.bf16.msra.mxu0 %v2299_v34 }
 0x540   :  { %2178 = vmatprep.subr.bf16.mxu0 %v2397_v9 }
 0x543   :  { %2179 = vmatpush3.bf16.msra.mxu0 %v2300_v37 }
 0x544   :  { %2180 = vmatprep.subr.bf16.mxu0 %v2397_v9 }
 0x547   :  { %2181 = vmatpush3.bf16.msra.mxu0 %v2301_v38 }
 0x548   :  { %2182 = vmatprep.subr.bf16.mxu0 %v2397_v9 }
 0x54b   :  { %2183 = vmatpush3.bf16.msra.mxu0 %v2302_v39  ;;  %v1986_v39 = vld [vmem:[%s2888_s14] ss:$0 sm:$0xff] }
 0x5fe   :  { %v659_v56 = vpop.f32.mrf.mxu0 }
 0x5ff   :  { %v660_v57 = vadd.f32 %v1970_v55, %v659_v56 }
 0x600   :  { %v2166_v58 = vpop.f32.mrf.mxu0 }
 0x601   :  { %v666_v59 = vadd.f32 %v660_v57, %v2537_v35  ;;  %v2297_v35 = vld [vmem:[%s2884_s10 + $0x8] sm:$0xff]  }
 0x602   :  { %v662_v60 = vpop.f32.mrf.mxu0  ;;  %2169 = vmatpush3.bf16.msra.mxu1 %v2297_v35 }
 0x603   :  { %v663_v61 = vadd.f32 %v1970_v55, %v662_v60  ;;  %v670_v62 = vsel %vm71_vm0, %v666_v59, 0.0  ;;  %v678_v63 = vmul.f32 %v666_v59, %v666_v59  ;;  %2170 = vmatprep.subr.bf16.mxu1 %v2397_v9 }
 0x604   :  { %671 = vadd.xlane.f32.xlu1 %v670_v62  ;;  %v2167_v0 = vpop.f32.mrf.mxu0 }
 0x605   :  { %v667_v1 = vadd.f32 %v663_v61, %v2539_v36  ;;  %v680_v2 = vsel %vm71_vm0, %v678_v63, 0.0 }
 0x606   :  { %681 = vadd.xlane.f32.xlu0 %v680_v2  ;;  %2171 = vmatpush3.bf16.msra.mxu1 %v2298_v6 }
 0x607   :  { %v673_v3 = vsel %vm71_vm0, %v667_v1, 0.0  ;;  %v679_v4 = vmul.f32 %v667_v1, %v667_v1  ;;  %2188 = vmatprep.subr.bf16.mxu1 %v2397_v9 }
 0x609   :  { %v683_v5 = vsel %vm71_vm0, %v679_v4, 0.0  ;;  %v1980_v4 = vld [vmem:[%s2887_s13] ss:$0 sm:$0xff] }
 0x60a   :  { %674 = vadd.xlane.f32.xlu0 %v673_v3 }
 0x60e   :  { %684 = vadd.xlane.f32.xlu0 %v683_v5 }
 0x68d   :  { %v672_v36 = vpop.xlane.xlu1 %671 }
 0x68e   :  { %v676_v7 = vmul.f32 0.03125, %v672_v36 }
 0x68f   :  { %v682_v8 = vpop.xlane.xlu0 %681 }
 0x690   :  { %v688_v10 = vmul.f32 %v676_v7, %v676_v7  ;;  %v686_v11 = vmul.f32 0.03125, %v682_v8  ;;  %v692_v22 = vsub.f32 %v666_v59, %v676_v7 }
 0x692   :  { %v690_v12 = vsub.f32 %v686_v11, %v688_v10 }
 0x693   :  { %v675_v13 = vpop.xlane.xlu0 %674 }
 0x694   :  { %v694_v14 = vadd.f32 1e-12, %v690_v12  ;;  %v677_v15 = vmul.f32 0.03125, %v675_v13 }
 0x696   :  { %2333 = vrsqrt.f32 %v694_v14  ;;  %v689_v17 = vmul.f32 %v677_v15, %v677_v15  ;;  %v693_v25 = vsub.f32 %v667_v1, %v677_v15 }
 0x697   :  { %v685_v16 = vpop.xlane.xlu0 %684 }
 0x698   :  { %v687_v18 = vmul.f32 0.03125, %v685_v16 }
 0x69a   :  { %v691_v19 = vsub.f32 %v687_v18, %v689_v17  ;;  %v2303_v18 = vld [vmem:[%s2904_s26 + $0x18] sm:$0xff]  }
 0x69c   :  { %v695_v20 = vadd.f32 1e-12, %v691_v19  ;;  %v2304_v19 = vld [vmem:[%s2904_s26 + $0x10] sm:$0xff]  }
 0x69e   :  { %2335 = vrsqrt.f32 %v695_v20 }
 0x6a3   :  { %v2334_v21 = vpop.eup %2333 }
 0x6a4   :  { %v698_v23 = vmul.f32 %v2334_v21, %v692_v22 }
 0x6a6   :  { %v706_v28 = vmul.f32 %v1974_v24, %v698_v23 }
 0x6a8   :  { %v714_v31 = vadd.f32 %v1975_v29, %v706_v28 }
 0x6ab   :  { %v2336_v26 = vpop.eup %2335 }
 0x6ac   :  { %v699_v27 = vmul.f32 %v2336_v26, %v693_v25 }
 0x6ae   :  { %v707_v30 = vmul.f32 %v1974_v24, %v699_v27 }
 0x6b0   :  { %v715_v32 = vadd.f32 %v1975_v29, %v707_v30 }
 0x6b2   :  { %v716_v33 = vpack.c.bf16 %v715_v32, %v714_v31 }
 0x6b4   :  { %2173 = vmatmul.mubr.msk.bf16.vlgmr.msra.gmra.mxu1 %vm71_vm0, %v716_v33 }
 0x6b5   :  { %2192 = vmatprep.mubr.msk.bf16.mxu1 %vm2398_vm1, %v2397_v9  ;;  %2189 = vmatpush3.bf16.msra.mxu1 %v2303_v18 }
 0x6b6   :  { %2190 = vmatprep.subr.bf16.mxu1 %v2397_v9 }
 0x6b9   :  { %2191 = vmatpush3.bf16.msra.mxu1 %v2304_v19 }
 0x774   :  { %v777_v41 = vpop.f32.mrf.mxu1 }
 0x775   :  { %v778_v42 = vadd.f32 %v1976_v40, %v777_v41 }
 0x776   :  { %v2174_v43 = vpop.f32.mrf.mxu1 }
 0x777   :  { %v786_v44 = vmul.f32 0.044715, %v778_v42  ;;  %v784_v62 = vmul.f32 0.5, %v778_v42 }
 0x778   :  { %v780_v45 = vpop.f32.mrf.mxu1 }
 0x779   :  { %v788_v46 = vmul.f32 %v786_v44, %v778_v42  ;;  %v781_v47 = vadd.f32 %v1976_v40, %v780_v45  ;;  %v1987_v44 = vld [vmem:[%s2889_s15] ss:$0 sm:$0xff] }
 0x77a   :  { %v2175_v48 = vpop.f32.mrf.mxu1 }
 0x77b   :  { %v790_v49 = vmul.f32 %v788_v46, %v778_v42  ;;  %v787_v50 = vmul.f32 0.044715, %v781_v47  ;;  %v785_v63 = vmul.f32 0.5, %v781_v47 }
 0x77d   :  { %v792_v52 = vadd.f32 %v790_v49, %v778_v42  ;;  %v789_v53 = vmul.f32 %v787_v50, %v781_v47  ;;  %v1993_v49 = vld [vmem:[%s2879_s5 + $0x1] ss:$0 sm:$0xff] }
 0x77f   :  { %v794_v55 = vmul.f32 0.7978846, %v792_v52  ;;  %v791_v56 = vmul.f32 %v789_v53, %v781_v47 }
 0x781   :  { %2337 = vtanh.f32 %v794_v55  ;;  %v793_v57 = vadd.f32 %v791_v56, %v781_v47 }
 0x783   :  { %v795_v58 = vmul.f32 0.7978846, %v793_v57 }
 0x785   :  { %2339 = vtanh.f32 %v795_v58 }
 0x78e   :  { %v2338_v59 = vpop.eup %2337 }
 0x78f   :  { %v798_v60 = vadd.f32 1.0, %v2338_v59 }
 0x791   :  { %v800_v1 = vmul.f32 %v798_v60, %v784_v62 }
 0x792   :  { %v2340_v61 = vpop.eup %2339 }
 0x793   :  { %v799_v0 = vadd.f32 1.0, %v2340_v61 }
 0x795   :  { %v801_v2 = vmul.f32 %v799_v0, %v785_v63 }
 0x797   :  { %v802_v3 = vpack.c.bf16 %v801_v2, %v800_v1 }
 0x799   :  { %2185 = vmatmul.mubr.msk.bf16.vlgmr.msra.gmra.mxu0 %vm842_vm3, %v802_v3 }
 0x859   :  { %v880_v5 = vpop.f32.mrf.mxu0 }
 0x85a   :  { %v881_v35 = vadd.f32 %v1980_v4, %v880_v5 }
 0x85b   :  { %v2186_v6 = vpop.f32.mrf.mxu0 }
 0x85c   :  { %v887_v36 = vadd.f32 %v881_v35, %v714_v31 }
 0x85d   :  { %v883_v7 = vpop.f32.mrf.mxu0 }
 0x85e   :  { %v884_v8 = vadd.f32 %v1980_v4, %v883_v7  ;;  %v891_v10 = vsel %vm71_vm0, %v887_v36, 0.0  ;;  %v899_v11 = vmul.f32 %v887_v36, %v887_v36 }
 0x85f   :  { %892 = vadd.xlane.f32.xlu1 %v891_v10  ;;  %v2187_v12 = vpop.f32.mrf.mxu0 }
 0x860   :  { %v888_v13 = vadd.f32 %v884_v8, %v715_v32  ;;  %v901_v14 = vsel %vm71_vm0, %v899_v11, 0.0 }
 0x862   :  { %v894_v15 = vsel %vm71_vm0, %v888_v13, 0.0  ;;  %v900_v16 = vmul.f32 %v888_v13, %v888_v13 }
 0x863   :  { %902 = vadd.xlane.f32.xlu1 %v901_v14  ;;  %895 = vadd.xlane.f32.xlu0 %v894_v15 }
 0x864   :  { %v904_v17 = vsel %vm71_vm0, %v900_v16, 0.0 }
 0x867   :  { %905 = vadd.xlane.f32.xlu0 %v904_v17 }
 0x8e8   :  { %v893_v20 = vpop.xlane.xlu1 %892 }
 0x8e9   :  { %v897_v21 = vmul.f32 0.03125, %v893_v20 }
 0x8eb   :  { %v909_v24 = vmul.f32 %v897_v21, %v897_v21  ;;  %v913_v34 = vsub.f32 %v887_v36, %v897_v21 }
 0x8ec   :  { %v903_v22 = vpop.xlane.xlu1 %902  ;;  %v896_v23 = vpop.xlane.xlu0 %895 }
 0x8ed   :  { %v907_v25 = vmul.f32 0.03125, %v903_v22  ;;  %v898_v26 = vmul.f32 0.03125, %v896_v23 }
 0x8ef   :  { %v911_v27 = vsub.f32 %v907_v25, %v909_v24  ;;  %v910_v30 = vmul.f32 %v898_v26, %v898_v26  ;;  %v914_v40 = vsub.f32 %v888_v13, %v898_v26 }
 0x8f0   :  { %v906_v28 = vpop.xlane.xlu0 %905 }
 0x8f1   :  { %v915_v29 = vadd.f32 1e-12, %v911_v27  ;;  %v908_v31 = vmul.f32 0.03125, %v906_v28 }
 0x8f3   :  { %2341 = vrsqrt.f32 %v915_v29  ;;  %v912_v32 = vsub.f32 %v908_v31, %v910_v30 }
 0x8f5   :  { %v916_v33 = vadd.f32 1e-12, %v912_v32 }
 0x8f7   :  { %2343 = vrsqrt.f32 %v916_v33 }
 0x900   :  { %v2342_v37 = vpop.eup %2341 }
 0x901   :  { %v919_v38 = vmul.f32 %v2342_v37, %v913_v34 }
 0x903   :  { %v927_v43 = vmul.f32 %v1986_v39, %v919_v38 }
 0x904   :  { %v2344_v41 = vpop.eup %2343 }
 0x905   :  { %v920_v42 = vmul.f32 %v2344_v41, %v914_v40  ;;  %v2696_v46 = vadd.f32 %v1987_v44, %v927_v43 }
 0x907   :  { %v928_v45 = vmul.f32 %v1986_v39, %v920_v42 }
 0x909   :  { %v2698_v47 = vadd.f32 %v1987_v44, %v928_v45 }
 0x90b   :  { %v937_v48 = vpack.c.bf16 %v2698_v47, %v2696_v46 }
 0x90d   :  { %2193 = vmatmul.mubr.msk.bf16.vlgmr.msra.gmra.mxu1 %vm71_vm0, %v937_v48 }
 0x9cd   :  { %v1000_v50 = vpop.f32.mrf.mxu1 }
 0x9ce   :  { %v2706_v52 = vadd.f32 %v1993_v49, %v1000_v50  ;;  %v2306_v50 = vld [vmem:[%s2880_s6 + $0x10] sm:$0xff]  }
 0x9cf   :  { %v2194_v53 = vpop.f32.mrf.mxu1 }
 0x9d0   :  { %1009 = vrot.lane.b32.xlu0 %v2706_v52, %s2399_s24  ;;  %2200 = vmatprep.mubr.msk.f32.mxu1 %vm195_vm2, %v2706_v52 }
 0x9d1   :  { %v1003_v55 = vpop.f32.mrf.mxu1 }
 0x9d2   :  { %v1004_v56 = vadd.f32 %v1993_v49, %v1003_v55  ;;  %v2305_v49 = vld [vmem:[%s2880_s6 + $0x18] sm:$0xff]  }
 0x9d3   :  { %v2195_v57 = vpop.f32.mrf.mxu1 }
 0x9d4   :  { %1207 = vrot.lane.b32.xlu0 %v1004_v56, %s2401_s25  ;;  %1011 = vrot.lane.b32.xlu1 %v1004_v56, %s2399_s24 }
 0x9d8   :  { %1211 = vrot.lane.b32.xlu1 %v1004_v56, %s2400_s2 }
 0x9dc   :  { %1209 = vrot.lane.b32.xlu1 %v2706_v52, %s2400_s2 }
 0x9e0   :  { %1205 = vrot.lane.b32.xlu1 %v2706_v52, %s2401_s25 }
 0xa42   :  { %v1010_v59 = vpop.permute.xlu0 %1009 }
 0xa46   :  { %v1012_v58 = vpop.permute.xlu1 %1011  ;;  %v1208_v63 = vpop.permute.xlu0 %1207 }
 0xa47   :  { %2196 = vmatprep.subr.msk.mxu1 %vm195_vm2, %v1012_v58 }
 0xa48   :  { %2197 = vmatpush3.xpose.msk.msra.mxu1 %vm195_vm2, %v1012_v58 }
 0xa49   :  { %2198 = vmatprep.subr.msk.mxu1 %vm195_vm2, %v1010_v59 }
 0xa4a   :  { %v1212_v60 = vpop.permute.xlu1 %1211 }
 0xa4b   :  { %2210 = vmatprep.subr.msk.mxu0 %vm195_vm2, %v1212_v60 }
 0xa4c   :  { %2199 = vmatpush3.xpose.msk.msra.mxu1 %vm195_vm2, %v1010_v59  ;;  %2211 = vmatpush3.xpose.msk.msra.mxu0 %vm195_vm2, %v1212_v60 }
 0xa4e   :  { %v1210_v61 = vpop.permute.xlu1 %1209 }
 0xa4f   :  { %2201 = vmatmul.mubr.msk.f32.vlgmr.msra.gmra.mxu1 %vm195_vm2, %v1004_v56  ;;  %2212 = vmatprep.subr.msk.mxu0 %vm195_vm2, %v1210_v61 }
 0xa50   :  { %2213 = vmatpush3.xpose.msk.msra.mxu0 %vm195_vm2, %v1210_v61 }
 0xa51   :  { %2224 = vmatprep.subr.bf16.mxu0 %v2397_v9 }
 0xa52   :  { %v1206_v62 = vpop.permute.xlu1 %1205 }
 0xa53   :  { %2214 = vmatprep.mubr.msk.f32.mxu0 %vm195_vm2, %v1206_v62 }
 0xa54   :  { %2215 = vmatmul.mubr.msk.f32.vlgmr.msra.gmra.mxu0 %vm195_vm2, %v1208_v63 }
 0xa55   :  { %2228 = vmatprep.mubr.msk.bf16.mxu0 %vm2398_vm1, %v2397_v9  ;;  %2225 = vmatpush3.bf16.msra.mxu0 %v2305_v49 }
 0xa56   :  { %2226 = vmatprep.subr.bf16.mxu0 %v2397_v9 }
 0xa59   :  { %2227 = vmatpush3.bf16.msra.mxu0 %v2306_v50 }
 0xa5a   :  { %2240 = vmatprep.subr.bf16.mxu0 %v2397_v9 }
 0xb0f   :  { %v2202_v0 = vpop.f32.mrf.mxu1 }
 0xb10   :  { %v1093_v1 = vadd.f32 %v2202_v0, %v2583_v51  ;;  %v2014_v0 = vld [vmem:[%s2881_s7 + $0x1] ss:$0 sm:$0xff] }
 0xb11   :  { %v1087_v2 = vpop.f32.mrf.mxu1 }
 0xb12   :  { %v1088_v3 = vadd.f32 %v1087_v2, %v2588_v54  ;;  %v1099_v4 = vsel %vm195_vm2, %v1093_v1, -inf }
 0xb13   :  { %1100 = vmax.xlane.f32.xlu0 %v1099_v4 }
 0xb14   :  { %v2216_v5 = vpop.f32.mrf.mxu0  ;;  %v1096_v35 = vsel %vm195_vm2, %v1088_v3, -inf }
 0xb15   :  { %1097 = vmax.xlane.f32.xlu1 %v1096_v35  ;;  %v1293_v7 = vadd.f32 %v2216_v5, %v2583_v51 }
 0xb16   :  { %v1287_v6 = vpop.f32.mrf.mxu0 }
 0xb17   :  { %v1288_v36 = vadd.f32 %v1287_v6, %v2588_v54  ;;  %v1299_v10 = vsel %vm195_vm2, %v1293_v7, -inf }
 0xb19   :  { %v1296_v8 = vsel %vm195_vm2, %v1288_v36, -inf }
 0xb1a   :  { %1297 = vmax.xlane.f32.xlu0 %v1296_v8 }
 0xb1e   :  { %1300 = vmax.xlane.f32.xlu0 %v1299_v10 }
 0xb26   :  { %1120 = vrot.lane.b32.xlu1 %v1004_v56, %s2402_s30 }
 0xb2a   :  { %1320 = vrot.lane.b32.xlu1 %v1004_v56, %s2403_s0 }
 0xb9c   :  { %v1101_v11 = vpop.xlane.xlu0 %1100 }
 0xb9d   :  { %v1103_v12 = vsub.f32 %v1093_v1, %v1101_v11 }
 0xb9e   :  { %v1098_v13 = vpop.xlane.xlu1 %1097 }
 0xb9f   :  { %v1106_v14 = vmul.f32 1.442695, %v1103_v12  ;;  %v1102_v15 = vsub.f32 %v1088_v3, %v1098_v13 }
 0xba1   :  { %2345 = vpow2.f32 %v1106_v14  ;;  %v1104_v16 = vmul.f32 1.442695, %v1102_v15  ;;  %v2308_v14 = vld [vmem:[%s2884_s10 + $0x10] sm:$0xff]  }
 0xba2   :  { %v1121_v54 = vpop.permute.xlu1 %1120 }
 0xba3   :  { %2347 = vpow2.f32 %v1104_v16  ;;  %2203 = vmatprep.subr.mxu1 %v1121_v54  ;;  %v1298_v51 = vpop.xlane.xlu0 %1297 }
 0xba4   :  { %v1302_v17 = vsub.f32 %v1288_v36, %v1298_v51  ;;  %2204 = vmatpush3.msra.mxu1 %v1121_v54 }
 0xba6   :  { %v1304_v18 = vmul.f32 1.442695, %v1302_v17  ;;  %v1321_v30 = vpop.permute.xlu1 %1320 }
 0xba7   :  { %v1301_v19 = vpop.xlane.xlu0 %1300 }
 0xba8   :  { %2349 = vpow2.f32 %v1304_v18  ;;  %v1303_v20 = vsub.f32 %v1293_v7, %v1301_v19 }
 0xbaa   :  { %v1306_v21 = vmul.f32 1.442695, %v1303_v20 }
 0xbac   :  { %2351 = vpow2.f32 %v1306_v21 }
 0xbae   :  { %v2346_v22 = vpop.eup %2345 }
 0xbaf   :  { %v1111_v23 = vsel %vm195_vm2, %v2346_v22, 0.0 }
 0xbb0   :  { %v2348_v24 = vpop.eup %2347  ;;  %1112 = vadd.xlane.f32.xlu0 %v1111_v23 }
 0xbb1   :  { %v1108_v25 = vsel %vm195_vm2, %v2348_v24, 0.0 }
 0xbb2   :  { %1109 = vadd.xlane.f32.xlu1 %v1108_v25 }
 0xbb5   :  { %v2350_v26 = vpop.eup %2349 }
 0xbb6   :  { %v1308_v27 = vsel %vm195_vm2, %v2350_v26, 0.0 }
 0xbb7   :  { %1309 = vadd.xlane.f32.xlu1 %v1308_v27 }
 0xbb9   :  { %v2352_v28 = vpop.eup %2351 }
 0xbba   :  { %v1311_v29 = vsel %vm195_vm2, %v2352_v28, 0.0 }
 0xbbb   :  { %1312 = vadd.xlane.f32.xlu0 %v1311_v29  ;;  %v2020_v29 = vld [vmem:[%s2882_s8 + $0x1] ss:$0 sm:$0xff] }
 0xbc8   :  { %1318 = vrot.lane.b32.xlu1 %v2706_v52, %s2403_s0 }
 0xbd1   :  { %1118 = vrot.lane.b32.xlu0 %v2706_v52, %s2402_s30 }
 0xc39   :  { %v1113_v31 = vpop.xlane.xlu0 %1112 }
 0xc3a   :  { %2353 = vrcp.f32 %v1113_v31 }
 0xc3b   :  { %v1110_v32 = vpop.xlane.xlu1 %1109 }
 0xc3c   :  { %2355 = vrcp.f32 %v1110_v32 }
 0xc40   :  { %v1310_v33 = vpop.xlane.xlu1 %1309 }
 0xc41   :  { %2357 = vrcp.f32 %v1310_v33 }
 0xc44   :  { %v1313_v34 = vpop.xlane.xlu0 %1312  ;;  %v1319_v43 = vpop.permute.xlu1 %1318 }
 0xc45   :  { %2359 = vrcp.f32 %v1313_v34  ;;  %v2021_v34 = vld [vmem:[%s2883_s9 + $0x1] ss:$0 sm:$0xff] }
 0xc47   :  { %v2354_v37 = vpop.eup %2353 }
 0xc48   :  { %v1119_v38 = vpop.permute.xlu0 %1118  ;;  %v1117_v41 = vmul.f32 %v2354_v37, %v2346_v22 }
 0xc49   :  { %v2356_v39 = vpop.eup %2355  ;;  %2205 = vmatprep.subr.mxu1 %v1119_v38 }
 0xc4a   :  { %2206 = vmatpush3.msra.mxu1 %v1119_v38  ;;  %v1116_v40 = vmul.f32 %v2356_v39, %v2348_v24 }
 0xc4b   :  { %2217 = vmatprep.subr.mxu1 %v1321_v30 }
 0xc4c   :  { %2207 = vmatprep.mubr.msk.f32.mxu1 %vm195_vm2, %v1116_v40 }
 0xc4d   :  { %2208 = vmatmul.mubr.msk.f32.vlgmr.msra.gmra.mxu1 %vm195_vm2, %v1117_v41  ;;  %v2309_v41 = vld [vmem:[%s2886_s12 + $0x38] sm:$0xff]  }
 0xc4e   :  { %v2358_v42 = vpop.eup %2357  ;;  %2218 = vmatpush3.msra.mxu1 %v1321_v30 }
 0xc4f   :  { %2219 = vmatprep.subr.mxu1 %v1319_v43  ;;  %v1316_v44 = vmul.f32 %v2358_v42, %v2350_v26  ;;  %v2310_v42 = vld [vmem:[%s2886_s12 + $0x30] sm:$0xff]  }
 0xc50   :  { %2220 = vmatpush3.msra.mxu1 %v1319_v43  ;;  %v2311_v43 = vld [vmem:[%s2886_s12 + $0x28] sm:$0xff]  }
 0xc51   :  { %2221 = vmatprep.mubr.msk.f32.mxu1 %vm195_vm2, %v1316_v44  ;;  %2232 = vmatprep.subr.bf16.mxu1 %v2397_v9  ;;  %v2312_v44 = vld [vmem:[%s2886_s12 + $0x20] sm:$0xff]  }
 0xc52   :  { %v2360_v45 = vpop.eup %2359 }
 0xc53   :  { %v1317_v48 = vmul.f32 %v2360_v45, %v2352_v28  ;;  %v2027_v45 = vld [vmem:[%s2885_s11 + $0x1] ss:$0 sm:$0xff] }
 0xc55   :  { %2222 = vmatmul.mubr.msk.f32.vlgmr.msra.gmra.mxu1 %vm195_vm2, %v1317_v48 }
 0xc56   :  { %2236 = vmatprep.mubr.msk.bf16.mxu1 %vm2398_vm1, %v2397_v9 }
 0xd0d   :  { %v2209_v52 = vpop.f32.mrf.mxu1 }
 0xd0f   :  { %v1196_v53 = vpop.f32.mrf.mxu1 }
 0xd15   :  { %v2223_v55 = vpop.f32.mrf.mxu1 }
 0xd17   :  { %v1396_v56 = vpop.f32.mrf.mxu1 }
 0xd18   :  { %v2288_v57 = vpack.i.bf16 %v2223_v55, %v1396_v56 }
 0xd1a   :  { %2289 = vrot.lane.b32.xlu1 %v2288_v57, %s2404_s3 }
 0xd8c   :  { %v2290_v58 = vpop.permute.xlu1 %2289 }
 0xd8d   :  { %v2292_v59 = vunpack.i.h.bf16 %v2290_v58  ;;  %v2291_v60 = vunpack.i.l.bf16 %v2290_v58 }
 0xd8f   :  { %v1414_v61 = vsel %vm195_vm2, %v2209_v52, %v2292_v59  ;;  %v1413_v62 = vsel %vm195_vm2, %v1196_v53, %v2291_v60 }
 0xd90   :  { %v1415_v63 = vpack.c.bf16 %v1414_v61, %v1413_v62 }
 0xd92   :  { %2229 = vmatmul.mubr.msk.bf16.vlgmr.msra.gmra.mxu0 %vm71_vm0, %v1415_v63 }
 0xd93   :  { %2248 = vmatprep.mubr.msk.bf16.mxu0 %vm2398_vm1, %v2397_v9  ;;  %2241 = vmatpush3.bf16.msra.mxu0 %v2309_v41 }
 0xd94   :  { %2242 = vmatprep.subr.bf16.mxu0 %v2397_v9 }
 0xd97   :  { %2243 = vmatpush3.bf16.msra.mxu0 %v2310_v42 }
 0xd98   :  { %2244 = vmatprep.subr.bf16.mxu0 %v2397_v9 }
 0xd9b   :  { %2245 = vmatpush3.bf16.msra.mxu0 %v2311_v43 }
 0xd9c   :  { %2246 = vmatprep.subr.bf16.mxu0 %v2397_v9 }
 0xd9f   :  { %2247 = vmatpush3.bf16.msra.mxu0 %v2312_v44 }
 0xe52   :  { %v1478_v1 = vpop.f32.mrf.mxu0 }
 0xe53   :  { %v1479_v2 = vadd.f32 %v2014_v0, %v1478_v1 }
 0xe54   :  { %v2230_v3 = vpop.f32.mrf.mxu0 }
 0xe55   :  { %v1485_v4 = vadd.f32 %v1479_v2, %v2696_v46  ;;  %v2307_v46 = vld [vmem:[%s2884_s10 + $0x18] sm:$0xff]  }
 0xe56   :  { %v1481_v5 = vpop.f32.mrf.mxu0  ;;  %2233 = vmatpush3.bf16.msra.mxu1 %v2307_v46 }
 0xe57   :  { %v1482_v35 = vadd.f32 %v2014_v0, %v1481_v5  ;;  %v1491_v6 = vsel %vm71_vm0, %v1485_v4, 0.0  ;;  %v1499_v36 = vmul.f32 %v1485_v4, %v1485_v4  ;;  %2234 = vmatprep.subr.bf16.mxu1 %v2397_v9 }
 0xe58   :  { %1492 = vadd.xlane.f32.xlu0 %v1491_v6  ;;  %v2231_v7 = vpop.f32.mrf.mxu0 }
 0xe59   :  { %v1486_v8 = vadd.f32 %v1482_v35, %v2698_v47  ;;  %v1501_v10 = vsel %vm71_vm0, %v1499_v36, 0.0 }
 0xe5a   :  { %2235 = vmatpush3.bf16.msra.mxu1 %v2308_v14 }
 0xe5b   :  { %v1494_v11 = vsel %vm71_vm0, %v1486_v8, 0.0  ;;  %v1500_v12 = vmul.f32 %v1486_v8, %v1486_v8  ;;  %2252 = vmatprep.subr.mxu1 %v2397_v9 }
 0xe5c   :  { %1502 = vadd.xlane.f32.xlu0 %v1501_v10  ;;  %1495 = vadd.xlane.f32.xlu1 %v1494_v11  ;;  %v2040_v10 = vld [vmem:[%s2887_s13 + $0x1] ss:$0 sm:$0xff] }
 0xe5d   :  { %v1504_v13 = vsel %vm71_vm0, %v1500_v12, 0.0 }
 0xe60   :  { %1505 = vadd.xlane.f32.xlu0 %v1504_v13 }
 0xee1   :  { %v1493_v47 = vpop.xlane.xlu0 %1492 }
 0xee2   :  { %v1497_v15 = vmul.f32 0.03125, %v1493_v47 }
 0xee4   :  { %v1509_v51 = vmul.f32 %v1497_v15, %v1497_v15  ;;  %v1513_v26 = vsub.f32 %v1485_v4, %v1497_v15 }
 0xee5   :  { %v1503_v16 = vpop.xlane.xlu0 %1502  ;;  %v1496_v54 = vpop.xlane.xlu1 %1495 }
 0xee6   :  { %v1507_v17 = vmul.f32 0.03125, %v1503_v16  ;;  %v1498_v18 = vmul.f32 0.03125, %v1496_v54 }
 0xee8   :  { %v1511_v19 = vsub.f32 %v1507_v17, %v1509_v51  ;;  %v1510_v22 = vmul.f32 %v1498_v18, %v1498_v18  ;;  %v1514_v30 = vsub.f32 %v1486_v8, %v1498_v18 }
 0xee9   :  { %v1506_v20 = vpop.xlane.xlu0 %1505 }
 0xeea   :  { %v1515_v21 = vadd.f32 1e-12, %v1511_v19  ;;  %v1508_v23 = vmul.f32 0.03125, %v1506_v20 }
 0xeec   :  { %2361 = vrsqrt.f32 %v1515_v21  ;;  %v1512_v24 = vsub.f32 %v1508_v23, %v1510_v22  ;;  %v1766_v21 = vld [vmem:[%s2890_s16 + $0x18] sm:$0xff]  ;;  %v1765_v22 = vld [vmem:[%s2890_s16 + $0x10] sm:$0xff]  ;;  %v1764_v23 = vld [vmem:[%s2890_s16 + $0x8] sm:$0xff] }
 0xeee   :  { %v1516_v25 = vadd.f32 1e-12, %v1512_v24  ;;  %v1763_v24 = vld [vmem:[%s2890_s16] sm:$0xff] }
 0xef0   :  { %2363 = vrsqrt.f32 %v1516_v25 }
 0xef9   :  { %v2362_v27 = vpop.eup %2361 }
 0xefa   :  { %v1519_v28 = vmul.f32 %v2362_v27, %v1513_v26 }
 0xefc   :  { %v1527_v33 = vmul.f32 %v2020_v29, %v1519_v28 }
 0xefd   :  { %v2364_v31 = vpop.eup %2363 }
 0xefe   :  { %v1520_v32 = vmul.f32 %v2364_v31, %v1514_v30  ;;  %v1535_v38 = vadd.f32 %v2021_v34, %v1527_v33 }
 0xf00   :  { %v1528_v37 = vmul.f32 %v2020_v29, %v1520_v32 }
 0xf02   :  { %v1536_v39 = vadd.f32 %v2021_v34, %v1528_v37 }
 0xf04   :  { %v1537_v40 = vpack.c.bf16 %v1536_v39, %v1535_v38 }
 0xf06   :  { %2237 = vmatmul.mubr.msk.bf16.vlgmr.msra.gmra.mxu1 %vm71_vm0, %v1537_v40 }
 0xf07   :  { %2260 = vmatprep.mubr.msk.f32.mxu1 %vm2398_vm1, %v2397_v9  ;;  %2253 = vmatpush3.msra.mxu1 %v1766_v21 }
 0xf08   :  { %2254 = vmatprep.subr.mxu1 %v2397_v9 }
 0xf09   :  { %2255 = vmatpush3.msra.mxu1 %v1765_v22 }
 0xf0a   :  { %2256 = vmatprep.subr.mxu1 %v2397_v9 }
 0xf0b   :  { %2257 = vmatpush3.msra.mxu1 %v1764_v23 }
 0xf0c   :  { %2258 = vmatprep.subr.mxu1 %v2397_v9 }
 0xf0d   :  { %2259 = vmatpush3.msra.mxu1 %v1763_v24 }
 0xf0e   :  { %2263 = vmatprep.subr.mxu1 %v2397_v9 }
 0xfc6   :  { %v1600_v48 = vpop.f32.mrf.mxu1 }
 0xfc7   :  { %v1601_v49 = vadd.f32 %v2027_v45, %v1600_v48  ;;  %v2048_v48 = vld [vmem:[%s2888_s14 + $0x1] ss:$0 sm:$0xff] }
 0xfc8   :  { %v2238_v50 = vpop.f32.mrf.mxu1 }
 0xfc9   :  { %v1609_v52 = vmul.f32 0.044715, %v1601_v49  ;;  %v1607_v5 = vmul.f32 0.5, %v1601_v49 }
 0xfca   :  { %v1603_v53 = vpop.f32.mrf.mxu1 }
 0xfcb   :  { %v1611_v55 = vmul.f32 %v1609_v52, %v1601_v49  ;;  %v1604_v56 = vadd.f32 %v2027_v45, %v1603_v53  ;;  %v2049_v53 = vld [vmem:[%s2889_s15 + $0x1] ss:$0 sm:$0xff] }
 0xfcc   :  { %v2239_v57 = vpop.f32.mrf.mxu1 }
 0xfcd   :  { %v1613_v58 = vmul.f32 %v1611_v55, %v1601_v49  ;;  %v1610_v59 = vmul.f32 0.044715, %v1604_v56  ;;  %v1608_v35 = vmul.f32 0.5, %v1604_v56 }
 0xfcf   :  { %v1615_v60 = vadd.f32 %v1613_v58, %v1601_v49  ;;  %v1612_v61 = vmul.f32 %v1610_v59, %v1604_v56  ;;  %v1855_v59 = vld [vmem:[%s2892_s18 + $0x18] sm:$0xff] }
 0xfd1   :  { %v1617_v62 = vmul.f32 0.7978846, %v1615_v60  ;;  %v1614_v63 = vmul.f32 %v1612_v61, %v1604_v56  ;;  %v1854_v60 = vld [vmem:[%s2892_s18 + $0x10] sm:$0xff]  ;;  %v1853_v61 = vld [vmem:[%s2892_s18 + $0x8] sm:$0xff] }
 0xfd3   :  { %2365 = vtanh.f32 %v1617_v62  ;;  %v1616_v0 = vadd.f32 %v1614_v63, %v1604_v56  ;;  %v1852_v62 = vld [vmem:[%s2892_s18] sm:$0xff]  ;;  %s2405_s18 = smov [#allocation2]  }
 0xfd4   :  { %v2050_v63 = vld [vmem:[%s2891_s17] ss:$0 sm:$0xff]  ;;  %s1944_s2 = sshll.u32 %s2405_s18, 4  ;;  %s1945_s2 = int_to_ptr.vmem [resolvable:$true] %s1944_s2 }
 0xfd5   :  { %v1618_v1 = vmul.f32 0.7978846, %v1616_v0  ;;  %s2375_s17 = scalar_lea.vmem %s1945_s2, 32  ;;  %p2380_p1 = scmp.lt.s32.totalorder %s1945_s2, %s1945_s2 }
 0xfd6   :  { %p2376_p0 = scmp.ne.s32.totalorder %s1945_s2, %s2375_s17  ;;  %p2381_p2 = scmp.lt.s32.totalorder %s2375_s17, %s2375_s17 }
 0xfd7   :  { %2367 = vtanh.f32 %v1618_v1 }
 0xfd8   :  { %p2382_p3 = por %p2381_p2, %p2380_p1 }
 0xfda   :  { %p2383_p4 = pnand %p2382_p3, %p2376_p0 }
 0xfe0   :  { %v2366_v2 = vpop.eup %2365 }
 0xfe1   :  { %v1621_v3 = vadd.f32 1.0, %v2366_v2 }
 0xfe3   :  { %v1623_v36 = vmul.f32 %v1621_v3, %v1607_v5 }
 0xfe4   :  { %v2368_v4 = vpop.eup %2367 }
 0xfe5   :  { %v1622_v6 = vadd.f32 1.0, %v2368_v4  ;;  %v2052_v4 = vld [vmem:[%s2893_s19] ss:$0 sm:$0xff] }
 0xfe7   :  { %v1624_v7 = vmul.f32 %v1622_v6, %v1608_v35 }
 0xfe9   :  { %v1625_v8 = vpack.c.bf16 %v1624_v7, %v1623_v36 }
 0xfeb   :  { %2249 = vmatmul.mubr.msk.bf16.vlgmr.msra.gmra.mxu0 %vm842_vm3, %v1625_v8 }
0x10ab   :  { %v1704_v11 = vpop.f32.mrf.mxu0 }
0x10ac   :  { %v1705_v12 = vadd.f32 %v2040_v10, %v1704_v11 }
0x10ad   :  { %v2250_v13 = vpop.f32.mrf.mxu0 }
0x10ae   :  { %v1711_v46 = vadd.f32 %v1705_v12, %v1535_v38 }
0x10af   :  { %v1707_v14 = vpop.f32.mrf.mxu0 }
0x10b0   :  { %v1708_v47 = vadd.f32 %v2040_v10, %v1707_v14  ;;  %v1717_v15 = vsel %vm71_vm0, %v1711_v46, 0.0  ;;  %v1725_v16 = vmul.f32 %v1711_v46, %v1711_v46 }
0x10b1   :  { %1718 = vadd.xlane.f32.xlu1 %v1717_v15  ;;  %v2251_v54 = vpop.f32.mrf.mxu0 }
0x10b2   :  { %v1712_v51 = vadd.f32 %v1708_v47, %v1536_v39  ;;  %v1727_v17 = vsel %vm71_vm0, %v1725_v16, 0.0 }
0x10b4   :  { %v1720_v18 = vsel %vm71_vm0, %v1712_v51, 0.0  ;;  %v1726_v19 = vmul.f32 %v1712_v51, %v1712_v51 }
0x10b5   :  { %1728 = vadd.xlane.f32.xlu1 %v1727_v17  ;;  %1721 = vadd.xlane.f32.xlu0 %v1720_v18 }
0x10b6   :  { %v1730_v20 = vsel %vm71_vm0, %v1726_v19, 0.0 }
0x10b9   :  { %1731 = vadd.xlane.f32.xlu0 %v1730_v20 }
0x113a   :  { %v1719_v25 = vpop.xlane.xlu1 %1718 }
0x113b   :  { %v1723_v26 = vmul.f32 0.03125, %v1719_v25 }
0x113d   :  { %v1735_v29 = vmul.f32 %v1723_v26, %v1723_v26  ;;  %v1739_v42 = vsub.f32 %v1711_v46, %v1723_v26 }
0x113e   :  { %v1729_v27 = vpop.xlane.xlu1 %1728  ;;  %v1722_v28 = vpop.xlane.xlu0 %1721 }
0x113f   :  { %v1733_v30 = vmul.f32 0.03125, %v1729_v27  ;;  %v1724_v31 = vmul.f32 0.03125, %v1722_v28 }
0x1141   :  { %v1737_v32 = vsub.f32 %v1733_v30, %v1735_v29  ;;  %v1736_v37 = vmul.f32 %v1724_v31, %v1724_v31  ;;  %v1740_v43 = vsub.f32 %v1712_v51, %v1724_v31 }
0x1142   :  { %v1732_v33 = vpop.xlane.xlu0 %1731 }
0x1143   :  { %v1741_v34 = vadd.f32 1e-12, %v1737_v32  ;;  %v1734_v38 = vmul.f32 0.03125, %v1732_v33 }
0x1145   :  { %2369 = vrsqrt.f32 %v1741_v34  ;;  %v1738_v39 = vsub.f32 %v1734_v38, %v1736_v37 }
0x1147   :  { %v1742_v40 = vadd.f32 1e-12, %v1738_v39 }
0x1149   :  { %2371 = vrsqrt.f32 %v1742_v40 }
0x1152   :  { %v2370_v41 = vpop.eup %2369 }
0x1153   :  { %v1745_v44 = vmul.f32 %v2370_v41, %v1739_v42 }
0x1155   :  { %v1753_v50 = vmul.f32 %v2048_v48, %v1745_v44 }
0x1156   :  { %v2372_v45 = vpop.eup %2371 }
0x1157   :  { %v1746_v49 = vmul.f32 %v2372_v45, %v1740_v43  ;;  %v1761_v56 = vadd.f32 %v2049_v53, %v1753_v50 }
0x1159   :  { %v1754_v52 = vmul.f32 %v2048_v48, %v1746_v49 }
0x115b   :  { %v1762_v55 = vadd.f32 %v2049_v53, %v1754_v52 }
0x115d   :  { %v1776_v57 = vrot.slane %v1762_v55, 7 }
0x115f   :  { %v1778_v58 = vsel %vm1777_vm4, %v1776_v57, %v1761_v56 }
0x1160   :  { %2261 = vmatmul.mubr.msk.f32.vlgmr.msra.gmra.mxu1 %vm71_vm0, %v1778_v58 }
0x1161   :  { %2271 = vmatprep.mubr.msk.f32.mxu1 %vm2398_vm1, %v2397_v9  ;;  %2264 = vmatpush3.msra.mxu1 %v1855_v59 }
0x1162   :  { %2265 = vmatprep.subr.mxu1 %v2397_v9 }
0x1163   :  { %2266 = vmatpush3.msra.mxu1 %v1854_v60 }
0x1164   :  { %2267 = vmatprep.subr.mxu1 %v2397_v9 }
0x1165   :  { %2268 = vmatpush3.msra.mxu1 %v1853_v61 }
0x1166   :  { %2269 = vmatprep.subr.mxu1 %v2397_v9 }
0x1167   :  { %2270 = vmatpush3.msra.mxu1 %v1852_v62 }
0x1220   :  { %v1847_v0 = vpop.f32.mrf.mxu1 }
0x1221   :  { %v1848_v1 = vadd.f32 %v2050_v63, %v1847_v0 }
0x1222   :  { %v2262_v2 = vpop.f32.mrf.mxu1 }
0x1223   :  { %2373 = vtanh.f32 %v1848_v1 }
0x1230   :  { %v2374_v3 = vpop.eup %2373 }
0x1231   :  { %2272 = vmatmul.mubr.msk.f32.vlgmr.msra.gmra.mxu1 %vm71_vm0, %v2374_v3 }
0x12f1   :  { %v1932_v5 = vpop.f32.mrf.mxu1 }
0x12f2   :  { %v1933_v9 = vadd.f32 %v2052_v4, %v1932_v5 }
0x12f3   :  { %v2273_v35 = vpop.f32.mrf.mxu1 }
0x12f4   :  { %1937 = vst.msk [vmem:[#allocation2] sm:$0x3] %vm1936_vm5, %v1933_v9 }
0x12f5   :  { %2386 = shalt.err (!%p2383_p4)
}
0x12f6   :  { %1947 = dma.vmem_to_hbm [thread:$0]  %s1945_s2, 32, %s2894_s20, [#allocation3]  }
0x12f7   :  { %2395 = dma.done.wait [#allocation3], 32  }
0x12f8   :  { %2396 = vsyncadd [#allocation3], 4294967264 }
0x12f9   :  { %1951 = vsyncpa [#allocation3], 1 }

</bundles_post_ra>
